<compile_context>
chip_gen: v6e
topology: v6e:2x2x1
jax: 0.10.0
libtpu: 0.0.40
codegen_flags: <defaults>
</compile_context>

<pallas_src>
import math
import jax
import jax.numpy as jnp
from jax.experimental import pallas as pl
from jax.experimental.pallas import tpu as pltpu

D = 48          # embedding dim (matches nn.LayerNorm(48))
H = 4           # attention heads
DH = D // H     # head dim = 12
HIDDEN = 4 * D  # MLP hidden = 192
EPS = 1e-6      # spec: nn.LayerNorm(48, eps=1e-06)


def _layernorm(x, g, b):
    mu = jnp.mean(x, axis=-1, keepdims=True)
    xc = x - mu
    var = jnp.mean(xc * xc, axis=-1, keepdims=True)
    inv = jax.lax.rsqrt(var + EPS)
    return xc * inv * g + b


def _gelu_tanh(x):
    c = math.sqrt(2.0 / math.pi)
    return 0.5 * x * (1.0 + jnp.tanh(c * (x + 0.044715 * x * x * x)))


def _split_heads(x2d_bf, Bt, S):
    """(Bt*S, D) head-packed on lanes -> (H*Bt, S, DH).

    Only static lane slices + a leading-dim stack + a non-lane reshape are
    used (no lane-splitting reshape), which Mosaic handles cheaply."""
    parts = [x2d_bf[:, h * DH:(h + 1) * DH] for h in range(H)]   # H x (Bt*S, DH)
    xh = jnp.stack(parts, axis=0)                                # (H, Bt*S, DH)
    return xh.reshape(H * Bt, S, DH)                             # flat order preserved


def t_block_kernel(xq_ref, xk_ref, xv_ref,
                   wattn_ref, w1_ref, w2_ref, bias_ref, b1_ref,
                   o_ref):
    Bt, Sq, _ = xq_ref.shape
    _, Sk, _ = xk_ref.shape
    Mq = Bt * Sq
    Mk = Bt * Sk

    # ---- load activations; flatten batch*seq for the dense layers ----------
    xq2 = xq_ref[...].reshape(Mq, D)                    # f32 residual path
    xq_bf = xq2.astype(jnp.bfloat16)                    # (Mq, D)
    xk_bf = xk_ref[...].reshape(Mk, D).astype(jnp.bfloat16)
    xv_bf = xv_ref[...].reshape(Mk, D).astype(jnp.bfloat16)

    # ---- parameters (packed slabs) ------------------------------------------
    wq = wattn_ref[0]                                   # (D, D) bf16, scale folded
    wk = wattn_ref[1]
    wv = wattn_ref[2]
    wo = wattn_ref[3]
    bias = bias_ref[...]                                # (9, D) f32
    bq, bk, bv, bo = bias[0], bias[1], bias[2], bias[3]
    ln1_g, ln1_b, ln2_g, ln2_b, b2 = bias[4], bias[5], bias[6], bias[7], bias[8]
    b1 = b1_ref[...]                                    # (1, HIDDEN) f32

    # ---- fused head-packed Q/K/V projections: 3 x (M,48)@(48,48) ------------
    q = jnp.dot(xq_bf, wq, preferred_element_type=jnp.float32) + bq   # (Mq, D)
    k = jnp.dot(xk_bf, wk, preferred_element_type=jnp.float32) + bk   # (Mk, D)
    v = jnp.dot(xv_bf, wv, preferred_element_type=jnp.float32) + bv   # (Mk, D)

    # ---- cross attention, all heads in one batched einsum each --------------
    qh = _split_heads(q.astype(jnp.bfloat16), Bt, Sq)   # (H*Bt, Sq, DH)
    kh = _split_heads(k.astype(jnp.bfloat16), Bt, Sk)   # (H*Bt, Sk, DH)
    vh = _split_heads(v.astype(jnp.bfloat16), Bt, Sk)   # (H*Bt, Sk, DH)

    s = jnp.einsum('nqd,nkd->nqk', qh, kh,
                   preferred_element_type=jnp.float32)            # (H*Bt, Sq, Sk)
    s = s - jnp.max(s, axis=-1, keepdims=True)
    p = jnp.exp(s)
    # approx reciprocal (EUP); ~1e-3 rel. error vs exact softmax divide.
    p = p * pl.reciprocal(jnp.sum(p, axis=-1, keepdims=True), approx=True)

    ctx = jnp.einsum('nqk,nkd->nqd', p.astype(jnp.bfloat16), vh,
                     preferred_element_type=jnp.float32)          # (H*Bt, Sq, DH)

    # merge heads back onto lanes (h-major, matching Wo's input layout) and do
    # ONE output-projection dot with K = 48.
    ctx_h = ctx.astype(jnp.bfloat16).reshape(H, Mq, DH)
    ctx_merged = jnp.concatenate([ctx_h[h] for h in range(H)], axis=-1)  # (Mq, D)
    attn = jnp.dot(ctx_merged, wo, preferred_element_type=jnp.float32) + bo

    # ---- residual + LN1 (f32) ------------------------------------------------
    op = _layernorm(xq2 + attn, ln1_g, ln1_b)

    # ---- MLP -----------------------------------------------------------------
    h1 = jnp.dot(op.astype(jnp.bfloat16), w1_ref[...],
                 preferred_element_type=jnp.float32) + b1
    h1 = _gelu_tanh(h1)
    mlp = jnp.dot(h1.astype(jnp.bfloat16), w2_ref[...],
                  preferred_element_type=jnp.float32) + b2

    # ---- residual + LN2 ------------------------------------------------------
    out = _layernorm(mlp + op, ln2_g, ln2_b)
    o_ref[...] = out.reshape(Bt, Sq, D).astype(o_ref.dtype)


def t_block(Xq, Xk, Xv, params, *, batch_tile=None, vmem_limit_bytes=None):
    """params must be the output of prepare_params().

    batch_tile: default B -> single grid step (best on single-TC v5e/v6e).
                On v7x set batch_tile = B // 2 (or smaller) so the 'parallel'
                grid axis spans both TensorCores; re-derive VMEM for large
                shapes (v7x has 64 MiB physical / 32 MiB scoped default) and
                pass vmem_limit_bytes explicitly if needed.
    """
    B, Sq, _ = Xq.shape
    _, Sk, _ = Xk.shape
    if batch_tile is None:
        batch_tile = B                      # toy sizes: one grid step total
    assert B % batch_tile == 0
    grid = (B // batch_tile,)

    def data_spec(S):
        return pl.BlockSpec((batch_tile, S, D), lambda i: (i, 0, 0))

    def full_spec(arr):
        nd = arr.ndim
        return pl.BlockSpec(arr.shape, lambda i, _nd=nd: (0,) * _nd)

    in_specs = ([data_spec(Sq), data_spec(Sk), data_spec(Sk)]
                + [full_spec(p) for p in params])

    # Advisory cost hint so XLA schedules the tiny custom call sensibly.
    Mq, Mk = B * Sq, B * Sk
    flops = (2 * Mq * D * D                 # Q projection
             + 2 * Mk * D * D * 2           # K, V projections
             + 2 * B * H * Sq * Sk * DH * 2  # scores + ctx
             + 2 * Mq * D * D               # output projection
             + 2 * Mq * D * HIDDEN * 2)     # MLP
    transcendentals = B * H * Sq * Sk + Mq * HIDDEN        # exp + tanh
    bytes_accessed = (Xq.nbytes + Xk.nbytes + Xv.nbytes
                      + sum(int(p.nbytes) for p in params)
                      + Mq * D * Xq.dtype.itemsize)

    return pl.pallas_call(
        t_block_kernel,
        out_shape=jax.ShapeDtypeStruct((B, Sq, D), Xq.dtype),
        grid=grid,
        in_specs=in_specs,
        out_specs=data_spec(Sq),
        compiler_params=pltpu.CompilerParams(
            dimension_semantics=("parallel",),
            vmem_limit_bytes=vmem_limit_bytes),
        cost_estimate=pl.CostEstimate(
            flops=flops, transcendentals=transcendentals,
            bytes_accessed=bytes_accessed),
    )(Xq, Xk, Xv, *params)


def init_params(key):
    """Standard-format synthetic parameters (weights stored (in, out))."""
    ks = jax.random.split(key, 8)

    def w(k, shape):
        return 0.02 * jax.random.normal(k, shape, jnp.float32)

    return [
        w(ks[0], (D, D)), jnp.zeros((1, D), jnp.float32),        # Wq, bq
        w(ks[1], (D, D)), jnp.zeros((1, D), jnp.float32),        # Wk, bk
        w(ks[2], (D, D)), jnp.zeros((1, D), jnp.float32),        # Wv, bv
        w(ks[3], (D, D)), jnp.zeros((1, D), jnp.float32),        # Wo, bo
        jnp.ones((1, D), jnp.float32), jnp.zeros((1, D), jnp.float32),   # ln1 g, b
        jnp.ones((1, D), jnp.float32), jnp.zeros((1, D), jnp.float32),   # ln2 g, b
        w(ks[4], (D, HIDDEN)), jnp.zeros((1, HIDDEN), jnp.float32),      # W1, b1
        w(ks[5], (HIDDEN, D)), jnp.zeros((1, D), jnp.float32),           # W2, b2
    ]


def prepare_params(std):
    """One-time conversion to the kernel's packed layout.

    - Q/K/V/O weights kept head-packed (out lanes ordered head-major, DH-minor,
      matching PyTorch's in_proj/out_proj split) and stacked into ONE bf16 slab
      (4, D, D); attention scale 1/sqrt(DH) folded into Wq/bq.
    - MLP weights stored bf16 (f32 accumulation in-kernel).
    - All 48-wide biases / LayerNorm params packed into ONE f32 slab (9, D);
      the 192-wide MLP hidden bias stays its own (1, HIDDEN) f32 array.
    """
    (wq, bq, wk, bk, wv, bv, wo, bo,
     g1, be1, g2, be2, w1, b1, w2, b2) = std
    scale = 1.0 / math.sqrt(DH)

    w_attn = jnp.stack([wq * scale, wk, wv, wo], axis=0).astype(jnp.bfloat16)  # (4,D,D)
    bias9 = jnp.concatenate(
        [bq * scale, bk, bv, bo, g1, be1, g2, be2, b2], axis=0
    ).astype(jnp.float32)                                                      # (9, D)

    return [w_attn,
            w1.astype(jnp.bfloat16), w2.astype(jnp.bfloat16),
            bias9, b1.astype(jnp.float32)]


if __name__ == "__main__":
    key = jax.random.PRNGKey(0)
    k_xq, k_xk, k_xv, k_par = jax.random.split(key, 4)

    B, Sq, Sk = 2, 8, 8
    Xq = jax.random.normal(k_xq, (B, Sq, D), jnp.float32)
    Xk = jax.random.normal(k_xk, (B, Sk, D), jnp.float32)
    Xv = jax.random.normal(k_xv, (B, Sk, D), jnp.float32)

    params = prepare_params(init_params(k_par))

    out = t_block(Xq, Xk, Xv, params)
    jax.block_until_ready(out)
    assert out.shape == (B, Sq, D) and out.dtype == jnp.float32
    assert bool(jnp.all(jnp.isfinite(out)))
    print("KERNEL_OK")
</pallas_src>

<mosaic_0001>
module attributes {stable_mosaic.version = 11 : i64} {
  func.func @t_block_kernel(%arg0: i32, %arg1: memref<2x8x48xf32, #tpu.memory_space<vmem>>, %arg2: memref<2x8x48xf32, #tpu.memory_space<vmem>>, %arg3: memref<2x8x48xf32, #tpu.memory_space<vmem>>, %arg4: memref<4x48x48xbf16, #tpu.memory_space<vmem>>, %arg5: memref<48x192xbf16, #tpu.memory_space<vmem>>, %arg6: memref<192x48xbf16, #tpu.memory_space<vmem>>, %arg7: memref<9x48xf32, #tpu.memory_space<vmem>>, %arg8: memref<1x192xf32, #tpu.memory_space<vmem>>, %arg9: memref<2x8x48xf32, #tpu.memory_space<vmem>>) attributes {dimension_semantics = [#tpu.dimension_semantics<parallel>], iteration_bounds = array<i64: 1>, scalar_prefetch = 0 : i64, scratch_operands = 0 : i64, tpu.core_type = #tpu.core_type<tc>, window_params = [{transform_indices = @transform_0, window_bounds = array<i64: 2, 8, 48>}, {transform_indices = @transform_1, window_bounds = array<i64: 2, 8, 48>}, {transform_indices = @transform_2, window_bounds = array<i64: 2, 8, 48>}, {pipeline_mode = #tpu.pipeline_mode<synchronous>, transform_indices = @transform_3, window_bounds = array<i64: 4, 48, 48>}, {pipeline_mode = #tpu.pipeline_mode<synchronous>, transform_indices = @transform_4, window_bounds = array<i64: 48, 192>}, {pipeline_mode = #tpu.pipeline_mode<synchronous>, transform_indices = @transform_5, window_bounds = array<i64: 192, 48>}, {pipeline_mode = #tpu.pipeline_mode<synchronous>, transform_indices = @transform_6, window_bounds = array<i64: 9, 48>}, {pipeline_mode = #tpu.pipeline_mode<synchronous>, transform_indices = @transform_7, window_bounds = array<i64: 1, 192>}, {transform_indices = @transform_8, window_bounds = array<i64: 2, 8, 48>}]} {
    %c0 = arith.constant 0 : index
    %c0_0 = arith.constant 0 : index
    %c0_1 = arith.constant 0 : index
    %0 = vector.load %arg1[%c0, %c0_0, %c0_1] : memref<2x8x48xf32, #tpu.memory_space<vmem>>, vector<2x8x48xf32>
    %1 = vector.shape_cast %0 : vector<2x8x48xf32> to vector<16x48xf32>
    %2 = arith.truncf %1 : vector<16x48xf32> to vector<16x48xbf16>
    %c0_2 = arith.constant 0 : index
    %c0_3 = arith.constant 0 : index
    %c0_4 = arith.constant 0 : index
    %3 = vector.load %arg2[%c0_2, %c0_3, %c0_4] : memref<2x8x48xf32, #tpu.memory_space<vmem>>, vector<2x8x48xf32>
    %4 = vector.shape_cast %3 : vector<2x8x48xf32> to vector<16x48xf32>
    %5 = arith.truncf %4 : vector<16x48xf32> to vector<16x48xbf16>
    %c0_5 = arith.constant 0 : index
    %c0_6 = arith.constant 0 : index
    %c0_7 = arith.constant 0 : index
    %6 = vector.load %arg3[%c0_5, %c0_6, %c0_7] : memref<2x8x48xf32, #tpu.memory_space<vmem>>, vector<2x8x48xf32>
    %7 = vector.shape_cast %6 : vector<2x8x48xf32> to vector<16x48xf32>
    %8 = arith.truncf %7 : vector<16x48xf32> to vector<16x48xbf16>
    %c0_8 = arith.constant 0 : index
    %c0_9 = arith.constant 0 : index
    %c0_10 = arith.constant 0 : index
    %9 = vector.load %arg4[%c0_8, %c0_9, %c0_10] : memref<4x48x48xbf16, #tpu.memory_space<vmem>>, vector<1x48x48xbf16>
    %10 = vector.shape_cast %9 : vector<1x48x48xbf16> to vector<48x48xbf16>
    %c1 = arith.constant 1 : index
    %c0_11 = arith.constant 0 : index
    %c0_12 = arith.constant 0 : index
    %11 = vector.load %arg4[%c1, %c0_11, %c0_12] : memref<4x48x48xbf16, #tpu.memory_space<vmem>>, vector<1x48x48xbf16>
    %12 = vector.shape_cast %11 : vector<1x48x48xbf16> to vector<48x48xbf16>
    %c2 = arith.constant 2 : index
    %c0_13 = arith.constant 0 : index
    %c0_14 = arith.constant 0 : index
    %13 = vector.load %arg4[%c2, %c0_13, %c0_14] : memref<4x48x48xbf16, #tpu.memory_space<vmem>>, vector<1x48x48xbf16>
    %14 = vector.shape_cast %13 : vector<1x48x48xbf16> to vector<48x48xbf16>
    %c3 = arith.constant 3 : index
    %c0_15 = arith.constant 0 : index
    %c0_16 = arith.constant 0 : index
    %15 = vector.load %arg4[%c3, %c0_15, %c0_16] : memref<4x48x48xbf16, #tpu.memory_space<vmem>>, vector<1x48x48xbf16>
    %16 = vector.shape_cast %15 : vector<1x48x48xbf16> to vector<48x48xbf16>
    %c0_17 = arith.constant 0 : index
    %c0_18 = arith.constant 0 : index
    %17 = vector.load %arg7[%c0_17, %c0_18] : memref<9x48xf32, #tpu.memory_space<vmem>>, vector<9x48xf32>
    %18 = vector.extract_strided_slice %17 {offsets = [0, 0], sizes = [1, 48], strides = [1, 1]} : vector<9x48xf32> to vector<1x48xf32>
    %19 = vector.shape_cast %18 : vector<1x48xf32> to vector<48xf32>
    %20 = vector.extract_strided_slice %17 {offsets = [1, 0], sizes = [1, 48], strides = [1, 1]} : vector<9x48xf32> to vector<1x48xf32>
    %21 = vector.shape_cast %20 : vector<1x48xf32> to vector<48xf32>
    %22 = vector.extract_strided_slice %17 {offsets = [2, 0], sizes = [1, 48], strides = [1, 1]} : vector<9x48xf32> to vector<1x48xf32>
    %23 = vector.shape_cast %22 : vector<1x48xf32> to vector<48xf32>
    %24 = vector.extract_strided_slice %17 {offsets = [3, 0], sizes = [1, 48], strides = [1, 1]} : vector<9x48xf32> to vector<1x48xf32>
    %25 = vector.shape_cast %24 : vector<1x48xf32> to vector<48xf32>
    %26 = vector.extract_strided_slice %17 {offsets = [4, 0], sizes = [1, 48], strides = [1, 1]} : vector<9x48xf32> to vector<1x48xf32>
    %27 = vector.shape_cast %26 : vector<1x48xf32> to vector<48xf32>
    %28 = vector.extract_strided_slice %17 {offsets = [5, 0], sizes = [1, 48], strides = [1, 1]} : vector<9x48xf32> to vector<1x48xf32>
    %29 = vector.shape_cast %28 : vector<1x48xf32> to vector<48xf32>
    %30 = vector.extract_strided_slice %17 {offsets = [6, 0], sizes = [1, 48], strides = [1, 1]} : vector<9x48xf32> to vector<1x48xf32>
    %31 = vector.shape_cast %30 : vector<1x48xf32> to vector<48xf32>
    %32 = vector.extract_strided_slice %17 {offsets = [7, 0], sizes = [1, 48], strides = [1, 1]} : vector<9x48xf32> to vector<1x48xf32>
    %33 = vector.shape_cast %32 : vector<1x48xf32> to vector<48xf32>
    %34 = vector.extract_strided_slice %17 {offsets = [8, 0], sizes = [1, 48], strides = [1, 1]} : vector<9x48xf32> to vector<1x48xf32>
    %35 = vector.shape_cast %34 : vector<1x48xf32> to vector<48xf32>
    %c0_19 = arith.constant 0 : index
    %c0_20 = arith.constant 0 : index
    %36 = vector.load %arg8[%c0_19, %c0_20] : memref<1x192xf32, #tpu.memory_space<vmem>>, vector<1x192xf32>
    %cst = arith.constant dense<0.000000e+00> : vector<16x48xf32>
    %37 = tpu.matmul %2, %10, %cst {dimension_numbers = #tpu.dot_dimension_numbers<[1], [0], [0], [1], [0, 0, 1, 1], [], []>} : vector<16x48xbf16>, vector<48x48xbf16>, vector<16x48xf32> -> vector<16x48xf32>
    %38 = vector.shape_cast %19 : vector<48xf32> to vector<1x48xf32>
    %39 = vector.broadcast %38 : vector<1x48xf32> to vector<16x48xf32>
    %40 = arith.addf %37, %39 : vector<16x48xf32>
    %cst_21 = arith.constant dense<0.000000e+00> : vector<16x48xf32>
    %41 = tpu.matmul %5, %12, %cst_21 {dimension_numbers = #tpu.dot_dimension_numbers<[1], [0], [0], [1], [0, 0, 1, 1], [], []>} : vector<16x48xbf16>, vector<48x48xbf16>, vector<16x48xf32> -> vector<16x48xf32>
    %42 = vector.shape_cast %21 : vector<48xf32> to vector<1x48xf32>
    %43 = vector.broadcast %42 : vector<1x48xf32> to vector<16x48xf32>
    %44 = arith.addf %41, %43 : vector<16x48xf32>
    %cst_22 = arith.constant dense<0.000000e+00> : vector<16x48xf32>
    %45 = tpu.matmul %8, %14, %cst_22 {dimension_numbers = #tpu.dot_dimension_numbers<[1], [0], [0], [1], [0, 0, 1, 1], [], []>} : vector<16x48xbf16>, vector<48x48xbf16>, vector<16x48xf32> -> vector<16x48xf32>
    %46 = vector.shape_cast %23 : vector<48xf32> to vector<1x48xf32>
    %47 = vector.broadcast %46 : vector<1x48xf32> to vector<16x48xf32>
    %48 = arith.addf %45, %47 : vector<16x48xf32>
    %49 = arith.truncf %40 : vector<16x48xf32> to vector<16x48xbf16>
    %50 = vector.extract_strided_slice %49 {offsets = [0, 0], sizes = [16, 12], strides = [1, 1]} : vector<16x48xbf16> to vector<16x12xbf16>
    %51 = vector.extract_strided_slice %49 {offsets = [0, 12], sizes = [16, 12], strides = [1, 1]} : vector<16x48xbf16> to vector<16x12xbf16>
    %52 = vector.extract_strided_slice %49 {offsets = [0, 24], sizes = [16, 12], strides = [1, 1]} : vector<16x48xbf16> to vector<16x12xbf16>
    %53 = vector.extract_strided_slice %49 {offsets = [0, 36], sizes = [16, 12], strides = [1, 1]} : vector<16x48xbf16> to vector<16x12xbf16>
    %54 = vector.shape_cast %50 : vector<16x12xbf16> to vector<1x16x12xbf16>
    %55 = vector.shape_cast %51 : vector<16x12xbf16> to vector<1x16x12xbf16>
    %56 = vector.shape_cast %52 : vector<16x12xbf16> to vector<1x16x12xbf16>
    %57 = vector.shape_cast %53 : vector<16x12xbf16> to vector<1x16x12xbf16>
    %58 = tpu.concatenate %54, %55, %56, %57 in 0 : vector<1x16x12xbf16>, vector<1x16x12xbf16>, vector<1x16x12xbf16>, vector<1x16x12xbf16> -> vector<4x16x12xbf16>
    %59 = vector.shape_cast %58 : vector<4x16x12xbf16> to vector<8x8x12xbf16>
    %60 = arith.truncf %44 : vector<16x48xf32> to vector<16x48xbf16>
    %61 = vector.extract_strided_slice %60 {offsets = [0, 0], sizes = [16, 12], strides = [1, 1]} : vector<16x48xbf16> to vector<16x12xbf16>
    %62 = vector.extract_strided_slice %60 {offsets = [0, 12], sizes = [16, 12], strides = [1, 1]} : vector<16x48xbf16> to vector<16x12xbf16>
    %63 = vector.extract_strided_slice %60 {offsets = [0, 24], sizes = [16, 12], strides = [1, 1]} : vector<16x48xbf16> to vector<16x12xbf16>
    %64 = vector.extract_strided_slice %60 {offsets = [0, 36], sizes = [16, 12], strides = [1, 1]} : vector<16x48xbf16> to vector<16x12xbf16>
    %65 = vector.shape_cast %61 : vector<16x12xbf16> to vector<1x16x12xbf16>
    %66 = vector.shape_cast %62 : vector<16x12xbf16> to vector<1x16x12xbf16>
    %67 = vector.shape_cast %63 : vector<16x12xbf16> to vector<1x16x12xbf16>
    %68 = vector.shape_cast %64 : vector<16x12xbf16> to vector<1x16x12xbf16>
    %69 = tpu.concatenate %65, %66, %67, %68 in 0 : vector<1x16x12xbf16>, vector<1x16x12xbf16>, vector<1x16x12xbf16>, vector<1x16x12xbf16> -> vector<4x16x12xbf16>
    %70 = vector.shape_cast %69 : vector<4x16x12xbf16> to vector<8x8x12xbf16>
    %71 = arith.truncf %48 : vector<16x48xf32> to vector<16x48xbf16>
    %72 = vector.extract_strided_slice %71 {offsets = [0, 0], sizes = [16, 12], strides = [1, 1]} : vector<16x48xbf16> to vector<16x12xbf16>
    %73 = vector.extract_strided_slice %71 {offsets = [0, 12], sizes = [16, 12], strides = [1, 1]} : vector<16x48xbf16> to vector<16x12xbf16>
    %74 = vector.extract_strided_slice %71 {offsets = [0, 24], sizes = [16, 12], strides = [1, 1]} : vector<16x48xbf16> to vector<16x12xbf16>
    %75 = vector.extract_strided_slice %71 {offsets = [0, 36], sizes = [16, 12], strides = [1, 1]} : vector<16x48xbf16> to vector<16x12xbf16>
    %76 = vector.shape_cast %72 : vector<16x12xbf16> to vector<1x16x12xbf16>
    %77 = vector.shape_cast %73 : vector<16x12xbf16> to vector<1x16x12xbf16>
    %78 = vector.shape_cast %74 : vector<16x12xbf16> to vector<1x16x12xbf16>
    %79 = vector.shape_cast %75 : vector<16x12xbf16> to vector<1x16x12xbf16>
    %80 = tpu.concatenate %76, %77, %78, %79 in 0 : vector<1x16x12xbf16>, vector<1x16x12xbf16>, vector<1x16x12xbf16>, vector<1x16x12xbf16> -> vector<4x16x12xbf16>
    %81 = vector.shape_cast %80 : vector<4x16x12xbf16> to vector<8x8x12xbf16>
    "tpu.trace_start"() <{level = 10 : i32, message = "nqd,nkd->nqk"}> : () -> ()
    %cst_23 = arith.constant dense<0.000000e+00> : vector<8x8x8xf32>
    %82 = tpu.matmul %59, %70, %cst_23 {dimension_numbers = #tpu.dot_dimension_numbers<[2], [2], [1], [1], [0, 0, 0, 1, 1, 1], [0], [0]>} : vector<8x8x12xbf16>, vector<8x8x12xbf16>, vector<8x8x8xf32> -> vector<8x8x8xf32>
    "tpu.trace_stop"() : () -> ()
    %cst_24 = arith.constant dense<0xFF800000> : vector<8x8xf32>
    %83 = vector.multi_reduction <maximumf>, %82, %cst_24 [2] : vector<8x8x8xf32> to vector<8x8xf32>
    %84 = vector.shape_cast %83 : vector<8x8xf32> to vector<8x8x1xf32>
    %85 = vector.broadcast %84 : vector<8x8x1xf32> to vector<8x8x8xf32>
    %86 = arith.subf %82, %85 : vector<8x8x8xf32>
    %87 = math.exp %86 : vector<8x8x8xf32>
    %cst_25 = arith.constant dense<0.000000e+00> : vector<8x8xf32>
    %88 = vector.multi_reduction <add>, %87, %cst_25 [2] : vector<8x8x8xf32> to vector<8x8xf32>
    %89 = vector.shape_cast %88 : vector<8x8xf32> to vector<8x8x1xf32>
    %90 = tpu.reciprocal %89 {approx = true} : vector<8x8x1xf32> -> vector<8x8x1xf32>
    %91 = vector.broadcast %90 : vector<8x8x1xf32> to vector<8x8x8xf32>
    %92 = arith.mulf %87, %91 : vector<8x8x8xf32>
    %93 = arith.truncf %92 : vector<8x8x8xf32> to vector<8x8x8xbf16>
    "tpu.trace_start"() <{level = 10 : i32, message = "nqk,nkd->nqd"}> : () -> ()
    %cst_26 = arith.constant dense<0.000000e+00> : vector<8x8x12xf32>
    %94 = tpu.matmul %93, %81, %cst_26 {dimension_numbers = #tpu.dot_dimension_numbers<[2], [1], [1], [2], [0, 0, 0, 1, 1, 2], [0], [0]>} : vector<8x8x8xbf16>, vector<8x8x12xbf16>, vector<8x8x12xf32> -> vector<8x8x12xf32>
    "tpu.trace_stop"() : () -> ()
    %95 = arith.truncf %94 : vector<8x8x12xf32> to vector<8x8x12xbf16>
    %96 = vector.shape_cast %95 : vector<8x8x12xbf16> to vector<4x16x12xbf16>
    %97 = vector.extract_strided_slice %96 {offsets = [0, 0, 0], sizes = [1, 16, 12], strides = [1, 1, 1]} : vector<4x16x12xbf16> to vector<1x16x12xbf16>
    %98 = vector.shape_cast %97 : vector<1x16x12xbf16> to vector<16x12xbf16>
    %99 = vector.extract_strided_slice %96 {offsets = [1, 0, 0], sizes = [1, 16, 12], strides = [1, 1, 1]} : vector<4x16x12xbf16> to vector<1x16x12xbf16>
    %100 = vector.shape_cast %99 : vector<1x16x12xbf16> to vector<16x12xbf16>
    %101 = vector.extract_strided_slice %96 {offsets = [2, 0, 0], sizes = [1, 16, 12], strides = [1, 1, 1]} : vector<4x16x12xbf16> to vector<1x16x12xbf16>
    %102 = vector.shape_cast %101 : vector<1x16x12xbf16> to vector<16x12xbf16>
    %103 = vector.extract_strided_slice %96 {offsets = [3, 0, 0], sizes = [1, 16, 12], strides = [1, 1, 1]} : vector<4x16x12xbf16> to vector<1x16x12xbf16>
    %104 = vector.shape_cast %103 : vector<1x16x12xbf16> to vector<16x12xbf16>
    %105 = tpu.concatenate %98, %100, %102, %104 in 1 : vector<16x12xbf16>, vector<16x12xbf16>, vector<16x12xbf16>, vector<16x12xbf16> -> vector<16x48xbf16>
    %cst_27 = arith.constant dense<0.000000e+00> : vector<16x48xf32>
    %106 = tpu.matmul %105, %16, %cst_27 {dimension_numbers = #tpu.dot_dimension_numbers<[1], [0], [0], [1], [0, 0, 1, 1], [], []>} : vector<16x48xbf16>, vector<48x48xbf16>, vector<16x48xf32> -> vector<16x48xf32>
    %107 = vector.shape_cast %25 : vector<48xf32> to vector<1x48xf32>
    %108 = vector.broadcast %107 : vector<1x48xf32> to vector<16x48xf32>
    %109 = arith.addf %106, %108 : vector<16x48xf32>
    %110 = arith.addf %1, %109 : vector<16x48xf32>
    %cst_28 = arith.constant dense<0.000000e+00> : vector<16xf32>
    %111 = vector.multi_reduction <add>, %110, %cst_28 [1] : vector<16x48xf32> to vector<16xf32>
    %112 = vector.shape_cast %111 : vector<16xf32> to vector<16x1xf32>
    %cst_29 = arith.constant 4.800000e+01 : f32
    %113 = vector.broadcast %cst_29 : f32 to vector<16x1xf32>
    %114 = arith.divf %112, %113 : vector<16x1xf32>
    %115 = vector.broadcast %114 : vector<16x1xf32> to vector<16x48xf32>
    %116 = arith.subf %110, %115 : vector<16x48xf32>
    %117 = arith.mulf %116, %116 : vector<16x48xf32>
    %cst_30 = arith.constant dense<0.000000e+00> : vector<16xf32>
    %118 = vector.multi_reduction <add>, %117, %cst_30 [1] : vector<16x48xf32> to vector<16xf32>
    %119 = vector.shape_cast %118 : vector<16xf32> to vector<16x1xf32>
    %cst_31 = arith.constant 4.800000e+01 : f32
    %120 = vector.broadcast %cst_31 : f32 to vector<16x1xf32>
    %121 = arith.divf %119, %120 : vector<16x1xf32>
    %cst_32 = arith.constant 9.99999997E-7 : f32
    %122 = vector.broadcast %cst_32 : f32 to vector<16x1xf32>
    %123 = arith.addf %121, %122 : vector<16x1xf32>
    %124 = math.rsqrt %123 : vector<16x1xf32>
    %125 = vector.broadcast %124 : vector<16x1xf32> to vector<16x48xf32>
    %126 = arith.mulf %116, %125 : vector<16x48xf32>
    %127 = vector.shape_cast %27 : vector<48xf32> to vector<1x48xf32>
    %128 = vector.broadcast %127 : vector<1x48xf32> to vector<16x48xf32>
    %129 = arith.mulf %126, %128 : vector<16x48xf32>
    %130 = vector.shape_cast %29 : vector<48xf32> to vector<1x48xf32>
    %131 = vector.broadcast %130 : vector<1x48xf32> to vector<16x48xf32>
    %132 = arith.addf %129, %131 : vector<16x48xf32>
    %133 = arith.truncf %132 : vector<16x48xf32> to vector<16x48xbf16>
    %c0_33 = arith.constant 0 : index
    %c0_34 = arith.constant 0 : index
    %134 = vector.load %arg5[%c0_33, %c0_34] : memref<48x192xbf16, #tpu.memory_space<vmem>>, vector<48x192xbf16>
    %cst_35 = arith.constant dense<0.000000e+00> : vector<16x192xf32>
    %135 = tpu.matmul %133, %134, %cst_35 {dimension_numbers = #tpu.dot_dimension_numbers<[1], [0], [0], [1], [0, 0, 1, 1], [], []>} : vector<16x48xbf16>, vector<48x192xbf16>, vector<16x192xf32> -> vector<16x192xf32>
    %136 = vector.broadcast %36 : vector<1x192xf32> to vector<16x192xf32>
    %137 = arith.addf %135, %136 : vector<16x192xf32>
    %cst_36 = arith.constant 5.000000e-01 : f32
    %138 = vector.broadcast %cst_36 : f32 to vector<16x192xf32>
    %139 = arith.mulf %138, %137 : vector<16x192xf32>
    %cst_37 = arith.constant 4.471500e-02 : f32
    %140 = vector.broadcast %cst_37 : f32 to vector<16x192xf32>
    %141 = arith.mulf %140, %137 : vector<16x192xf32>
    %142 = arith.mulf %141, %137 : vector<16x192xf32>
    %143 = arith.mulf %142, %137 : vector<16x192xf32>
    %144 = arith.addf %137, %143 : vector<16x192xf32>
    %cst_38 = arith.constant 0.797884583 : f32
    %145 = vector.broadcast %cst_38 : f32 to vector<16x192xf32>
    %146 = arith.mulf %145, %144 : vector<16x192xf32>
    %147 = math.tanh %146 : vector<16x192xf32>
    %cst_39 = arith.constant 1.000000e+00 : f32
    %148 = vector.broadcast %cst_39 : f32 to vector<16x192xf32>
    %149 = arith.addf %148, %147 : vector<16x192xf32>
    %150 = arith.mulf %139, %149 : vector<16x192xf32>
    %151 = arith.truncf %150 : vector<16x192xf32> to vector<16x192xbf16>
    %c0_40 = arith.constant 0 : index
    %c0_41 = arith.constant 0 : index
    %152 = vector.load %arg6[%c0_40, %c0_41] : memref<192x48xbf16, #tpu.memory_space<vmem>>, vector<192x48xbf16>
    %cst_42 = arith.constant dense<0.000000e+00> : vector<16x48xf32>
    %153 = tpu.matmul %151, %152, %cst_42 {dimension_numbers = #tpu.dot_dimension_numbers<[1], [0], [0], [1], [0, 0, 1, 1], [], []>} : vector<16x192xbf16>, vector<192x48xbf16>, vector<16x48xf32> -> vector<16x48xf32>
    %154 = vector.shape_cast %35 : vector<48xf32> to vector<1x48xf32>
    %155 = vector.broadcast %154 : vector<1x48xf32> to vector<16x48xf32>
    %156 = arith.addf %153, %155 : vector<16x48xf32>
    %157 = arith.addf %156, %132 : vector<16x48xf32>
    %cst_43 = arith.constant dense<0.000000e+00> : vector<16xf32>
    %158 = vector.multi_reduction <add>, %157, %cst_43 [1] : vector<16x48xf32> to vector<16xf32>
    %159 = vector.shape_cast %158 : vector<16xf32> to vector<16x1xf32>
    %cst_44 = arith.constant 4.800000e+01 : f32
    %160 = vector.broadcast %cst_44 : f32 to vector<16x1xf32>
    %161 = arith.divf %159, %160 : vector<16x1xf32>
    %162 = vector.broadcast %161 : vector<16x1xf32> to vector<16x48xf32>
    %163 = arith.subf %157, %162 : vector<16x48xf32>
    %164 = arith.mulf %163, %163 : vector<16x48xf32>
    %cst_45 = arith.constant dense<0.000000e+00> : vector<16xf32>
    %165 = vector.multi_reduction <add>, %164, %cst_45 [1] : vector<16x48xf32> to vector<16xf32>
    %166 = vector.shape_cast %165 : vector<16xf32> to vector<16x1xf32>
    %cst_46 = arith.constant 4.800000e+01 : f32
    %167 = vector.broadcast %cst_46 : f32 to vector<16x1xf32>
    %168 = arith.divf %166, %167 : vector<16x1xf32>
    %cst_47 = arith.constant 9.99999997E-7 : f32
    %169 = vector.broadcast %cst_47 : f32 to vector<16x1xf32>
    %170 = arith.addf %168, %169 : vector<16x1xf32>
    %171 = math.rsqrt %170 : vector<16x1xf32>
    %172 = vector.broadcast %171 : vector<16x1xf32> to vector<16x48xf32>
    %173 = arith.mulf %163, %172 : vector<16x48xf32>
    %174 = vector.shape_cast %31 : vector<48xf32> to vector<1x48xf32>
    %175 = vector.broadcast %174 : vector<1x48xf32> to vector<16x48xf32>
    %176 = arith.mulf %173, %175 : vector<16x48xf32>
    %177 = vector.shape_cast %33 : vector<48xf32> to vector<1x48xf32>
    %178 = vector.broadcast %177 : vector<1x48xf32> to vector<16x48xf32>
    %179 = arith.addf %176, %178 : vector<16x48xf32>
    %180 = vector.shape_cast %179 : vector<16x48xf32> to vector<2x8x48xf32>
    %c0_48 = arith.constant 0 : index
    %c0_49 = arith.constant 0 : index
    %c0_50 = arith.constant 0 : index
    %181 = vector.load %arg9[%c0_48, %c0_49, %c0_50] : memref<2x8x48xf32, #tpu.memory_space<vmem>>, vector<2x8x48xf32>
    tpu.vector_store %arg9[%c0_48, %c0_49, %c0_50], %180 {strides = array<i32>} : memref<2x8x48xf32, #tpu.memory_space<vmem>>, vector<2x8x48xf32>,
    return
  }
  func.func @transform_0(%arg0: i32) -> (i32, i32, i32) {
    %c0_i32 = arith.constant 0 : i32
    %c0_i32_0 = arith.constant 0 : i32
    %c0_i32_1 = arith.constant 0 : i32
    return %arg0, %c0_i32, %c0_i32_0 : i32, i32, i32
  }
  func.func @transform_1(%arg0: i32) -> (i32, i32, i32) {
    %c0_i32 = arith.constant 0 : i32
    %c0_i32_0 = arith.constant 0 : i32
    %c0_i32_1 = arith.constant 0 : i32
    return %arg0, %c0_i32, %c0_i32_0 : i32, i32, i32
  }
  func.func @transform_2(%arg0: i32) -> (i32, i32, i32) {
    %c0_i32 = arith.constant 0 : i32
    %c0_i32_0 = arith.constant 0 : i32
    %c0_i32_1 = arith.constant 0 : i32
    return %arg0, %c0_i32, %c0_i32_0 : i32, i32, i32
  }
  func.func @transform_3(%arg0: i32) -> (i32, i32, i32) {
    %c0_i32 = arith.constant 0 : i32
    %c0_i32_0 = arith.constant 0 : i32
    %c0_i32_1 = arith.constant 0 : i32
    %c0_i32_2 = arith.constant 0 : i32
    return %c0_i32, %c0_i32_0, %c0_i32_1 : i32, i32, i32
  }
  func.func @transform_4(%arg0: i32) -> (i32, i32) {
    %c0_i32 = arith.constant 0 : i32
    %c0_i32_0 = arith.constant 0 : i32
    %c0_i32_1 = arith.constant 0 : i32
    return %c0_i32, %c0_i32_0 : i32, i32
  }
  func.func @transform_5(%arg0: i32) -> (i32, i32) {
    %c0_i32 = arith.constant 0 : i32
    %c0_i32_0 = arith.constant 0 : i32
    %c0_i32_1 = arith.constant 0 : i32
    return %c0_i32, %c0_i32_0 : i32, i32
  }
  func.func @transform_6(%arg0: i32) -> (i32, i32) {
    %c0_i32 = arith.constant 0 : i32
    %c0_i32_0 = arith.constant 0 : i32
    %c0_i32_1 = arith.constant 0 : i32
    return %c0_i32, %c0_i32_0 : i32, i32
  }
  func.func @transform_7(%arg0: i32) -> (i32, i32) {
    %c0_i32 = arith.constant 0 : i32
    %c0_i32_0 = arith.constant 0 : i32
    %c0_i32_1 = arith.constant 0 : i32
    return %c0_i32, %c0_i32_0 : i32, i32
  }
  func.func @transform_8(%arg0: i32) -> (i32, i32, i32) {
    %c0_i32 = arith.constant 0 : i32
    %c0_i32_0 = arith.constant 0 : i32
    %c0_i32_1 = arith.constant 0 : i32
    return %arg0, %c0_i32, %c0_i32_0 : i32, i32, i32
  }
}

</mosaic_0001>

<bundles_post_ra>
// kernel: tpu_custom_call.1
= control target key start
LH: loop header
LB: loop body
LE: loop exit
PB: predicated region body
PF: predicated region fallthrough
CT: control target
= control target key end

     0   :  { %13 = vsyncpa [#allocation3], 0  ;;  %s2609_s0 = inlined_call_operand.hbm [shape: f32[2,8,48], index: 0, kind: input, shape index: {}]   ;;  %s2610_s1 = inlined_call_operand.hbm [shape: f32[2,8,48], index: 1, kind: input, shape index: {}]   ;;  %s2611_s2 = inlined_call_operand.hbm [shape: f32[2,8,48], index: 2, kind: input, shape index: {}]   ;;  %s2612_s3 = inlined_call_operand.vmem [shape: bf16[4,48,48], index: 3, kind: input, shape index: {}]   ;;  %s2613_s4 = inlined_call_operand.vmem [shape: bf16[48,192], index: 4, kind: input, shape index: {}]   ;;  %s2614_s5 = inlined_call_operand.vmem [shape: bf16[192,48], index: 5, kind: input, shape index: {}]   ;;  %s2615_s6 = inlined_call_operand.hbm [shape: f32[9,48], index: 6, kind: input, shape index: {}]   ;;  %s2616_s7 = inlined_call_operand.vmem [shape: f32[1,192], index: 7, kind: input, shape index: {}]   ;;  %s2617_s8 = inlined_call_operand.hbm [shape: f32[2,8,48], index: 8, kind: output, shape index: {}]  }
   0x1   :  { %14 = vsyncpa [#allocation6], 0 }
   0x2   :  { %15 = vsyncpa [#allocation9], 0 }
   0x3   :  { %16 = vsyncpa [#allocation4], 0  ;;  %s2217_s27 = smov [#allocation5]   ;;  %s2218_s29 = smov [#allocation2]  }
   0x4   :  { %s34_s28 = sshll.u32 %s2217_s27, 4  ;;  %s22_s30 = sshll.u32 %s2218_s29, 4  ;;  %s35_s28 = int_to_ptr.vmem [resolvable:$true] %s34_s28  ;;  %s23_s30 = int_to_ptr.vmem [resolvable:$true] %s22_s30 }
   0x5   :  { %s2117_s9 = scalar_lea.vmem %s35_s28, 256  ;;  %p2122_p1 = scmp.lt.s32.totalorder %s35_s28, %s35_s28 }
   0x6   :  { %p2118_p0 = scmp.ne.s32.totalorder %s35_s28, %s2117_s9  ;;  %p2123_p2 = scmp.lt.s32.totalorder %s2117_s9, %s2117_s9 }
   0x8   :  { %p2124_p3 = por %p2123_p2, %p2122_p1 }
   0xa   :  { %p2125_p4 = pnand %p2124_p3, %p2118_p0 }
   0xc   :  { %2128 = shalt.err (!%p2125_p4)
}
   0xd   :  { %s2219_s10 = smov 128   ;;  %s2220_s11 = smov 8  }
   0xe   :  { %40 = dma.hbm_to_vmem [thread:$0]  %s2610_s1, 256, %s35_s28, [#allocation6], %s2219_s10, %s2219_s10, %s2220_s11  }
   0xf   :  { %s2137_s14 = scalar_lea.vmem %s23_s30, 256  ;;  %p2142_p6 = scmp.lt.s32.totalorder %s23_s30, %s23_s30 }
  0x10   :  { %p2138_p5 = scmp.ne.s32.totalorder %s23_s30, %s2137_s14  ;;  %p2143_p7 = scmp.lt.s32.totalorder %s2137_s14, %s2137_s14 }
  0x12   :  { %p2144_p8 = por %p2143_p7, %p2142_p6 }
  0x14   :  { %p2145_p9 = pnand %p2144_p8, %p2138_p5 }
  0x16   :  { %2148 = shalt.err (!%p2145_p9)
}
  0x17   :  { %28 = dma.hbm_to_vmem [thread:$0]  %s2609_s0, 256, %s23_s30, [#allocation3], %s2219_s10, %s2219_s10, %s2220_s11  }
  0x18   :  { %s2221_s17 = smov [#allocation7]   ;;  %s2222_s19 = smov [#allocation8]  }
  0x19   :  { %s46_s18 = sshll.u32 %s2221_s17, 4  ;;  %s64_s20 = sshll.u32 %s2222_s19, 4  ;;  %s47_s18 = int_to_ptr.vmem [resolvable:$true] %s46_s18  ;;  %s65_s20 = int_to_ptr.vmem [resolvable:$true] %s64_s20 }
  0x1a   :  { %s2157_s1 = scalar_lea.vmem %s47_s18, 256  ;;  %p2162_p11 = scmp.lt.s32.totalorder %s47_s18, %s47_s18 }
  0x1b   :  { %p2158_p10 = scmp.ne.s32.totalorder %s47_s18, %s2157_s1  ;;  %p2163_p12 = scmp.lt.s32.totalorder %s2157_s1, %s2157_s1 }
  0x1d   :  { %p2164_p13 = por %p2163_p12, %p2162_p11 }
  0x1f   :  { %p2165_p0 = pnand %p2164_p13, %p2158_p10 }
  0x21   :  { %2168 = shalt.err (!%p2165_p0)
}
  0x22   :  { %52 = dma.hbm_to_vmem [thread:$0]  %s2611_s2, 256, %s47_s18, [#allocation6], %s2219_s10, %s2219_s10, %s2220_s11  }
  0x23   :  { %s2177_s0 = scalar_lea.vmem %s65_s20, 256  ;;  %p2182_p2 = scmp.lt.s32.totalorder %s65_s20, %s65_s20 }
  0x24   :  { %p2178_p1 = scmp.ne.s32.totalorder %s65_s20, %s2177_s0  ;;  %p2183_p3 = scmp.lt.s32.totalorder %s2177_s0, %s2177_s0 }
  0x26   :  { %p2184_p4 = por %p2183_p3, %p2182_p2 }
  0x28   :  { %p2185_p5 = pnand %p2184_p4, %p2178_p1 }
  0x2a   :  { %2188 = shalt.err (!%p2185_p5)
}
  0x2b   :  { %70 = dma.hbm_to_vmem [thread:$0]  %s2615_s6, 256, %s65_s20, [#allocation9], %s2219_s10, %s2219_s10, %s2220_s11  }
  0x2c   :  { %2209 = dma.done.wait [#allocation3], 256  }
  0x2d   :  { %2210 = vsyncadd [#allocation3], 4294967040 }
  0x2e   :  { %2211 = dma.done.wait [#allocation6], 512  }
  0x2f   :  { %2212 = vsyncadd [#allocation6], 4294966784 }
  0x30   :  { %2213 = dma.done.wait [#allocation9], 256  }
  0x31   :  { %2214 = vsyncadd [#allocation9], 4294967040  ;;  %v2223_v0 = vmov 0.0   ;;  %vm2224_vm0 = vmmov 0   ;;  %v2027_v1 = vld [vmem:[%s2612_s3 + $0x10] sm:$0xff]   ;;  %v2028_v2 = vld [vmem:[%s2612_s3 + $0x8] sm:$0xff]   ;;  %v125_v19 = vlaneseq }
  0x32   :  { %1875 = vmatprep.subr.bf16.mxu1 %v2223_v0  ;;  %1881 = vmatprep.mubr.msk.bf16.mxu1 %vm2224_vm0, %v2223_v0  ;;  %v2029_v3 = vld [vmem:[%s2612_s3] sm:$0xff]   ;;  %v2320_v5 = vld [vmem:[#allocation2 + $0x8] sm:$0xff]  ;;  %vm147_vm1 = vcmask 392192   ;;  %v2032_v9 = vld [vmem:[%s2612_s3 + $0x18] sm:$0xff]   ;;  %vm396_vm2 = vcmask 97280   ;;  %s2225_s1 = smov 104  }
  0x33   :  { %1917 = vmatprep.subr.bf16.mxu0 %v2223_v0  ;;  %1919 = vmatprep.mubr.msk.bf16.mxu0 %vm2224_vm0, %v2223_v0  ;;  %v2318_v4 = vld [vmem:[#allocation2] sm:$0xff]  ;;  %v2030_v6 = vld [vmem:[%s2612_s3 + $0x28] sm:$0xff]   ;;  %v89_v10 = vld [vmem:[#allocation5] sm:$0xff]  ;;  %v2359_v22 = vshrl.u32 %v125_v19, 7  ;;  %s2226_s21 = smov 116   ;;  %s2227_s22 = smov 92  }
  0x34   :  { %1876 = vmatpush3.bf16.msra.mxu1 %v2027_v1  ;;  %v88_v7 = vpack.c.bf16 %v2320_v5, %v2318_v4  ;;  %v2031_v8 = vld [vmem:[%s2612_s3 + $0x20] sm:$0xff]   ;;  %v90_v11 = vld [vmem:[#allocation5 + $0x8] sm:$0xff]  ;;  %v2035_v15 = vld [vmem:[%s2612_s3 + $0x30] sm:$0xff]   ;;  %vm865_vm3 = vcmask 1043456   ;;  %vm765_vm4 = vcmask 64512   ;;  %s2228_s26 = smov 12  }
  0x35   :  { %1877 = vmatprep.subr.bf16.mxu1 %v2223_v0  ;;  %v91_v12 = vpack.c.bf16 %v90_v11, %v89_v10  ;;  %v2033_v13 = vld [vmem:[%s2612_s3 + $0x40] sm:$0xff]   ;;  %v2034_v14 = vld [vmem:[%s2612_s3 + $0x38] sm:$0xff]   ;;  %v93_v17 = vld [vmem:[#allocation7 + $0x8] sm:$0xff]  ;;  %v194_v24 = vsub.s32 1, %v2359_v22  ;;  %v127_v28 = vsub.s32 0, %v2359_v22  ;;  %v260_v46 = vsub.s32 2, %v2359_v22 }
  0x36   :  { %v92_v16 = vld [vmem:[#allocation7] sm:$0xff]  ;;  %v2362_v26 = vld [vmem:[#allocation8] sm:$0xff]  ;;  %s2229_s27 = smov 24   ;;  %vm1268_vm5 = vcmask 195584   ;;  %vm1271_vm6 = vcmask 293888   ;;  %vm1612_vm7 = vcmask 523264  }
  0x37   :  { %v94_v18 = vpack.c.bf16 %v93_v17, %v92_v16  ;;  %v195_v27 = vrot.slane %v2362_v26, %v194_v24  ;;  %v128_v32 = vrot.slane %v2362_v26, %v127_v28  ;;  %v261_v47 = vrot.slane %v2362_v26, %v260_v46 }
  0x38   :  { %1878 = vmatpush3.bf16.msra.mxu1 %v2028_v2 }
  0x39   :  { %1879 = vmatprep.subr.bf16.mxu1 %v2223_v0 }
  0x3c   :  { %1880 = vmatpush3.bf16.msra.mxu1 %v2029_v3 }
  0x3d   :  { %1885 = vmatprep.subr.bf16.mxu1 %v2223_v0 }
  0x3f   :  { %1882 = vmatmul.mubr.msk.bf16.vlgmr.msra.gmra.mxu1 %vm147_vm1, %v88_v7 }
  0x40   :  { %1886 = vmatpush3.bf16.msra.mxu1 %v2030_v6  ;;  %1891 = vmatprep.mubr.msk.bf16.mxu1 %vm2224_vm0, %v2223_v0 }
  0x41   :  { %1887 = vmatprep.subr.bf16.mxu1 %v2223_v0 }
  0x44   :  { %1888 = vmatpush3.bf16.msra.mxu1 %v2031_v8 }
  0x45   :  { %1889 = vmatprep.subr.bf16.mxu1 %v2223_v0 }
  0x48   :  { %1890 = vmatpush3.bf16.msra.mxu1 %v2032_v9 }
  0x49   :  { %1895 = vmatprep.subr.bf16.mxu1 %v2223_v0 }
  0x4b   :  { %1892 = vmatmul.mubr.msk.bf16.vlgmr.msra.gmra.mxu1 %vm147_vm1, %v91_v12 }
  0x4c   :  { %1901 = vmatprep.mubr.msk.bf16.mxu1 %vm2224_vm0, %v2223_v0  ;;  %1896 = vmatpush3.bf16.msra.mxu1 %v2033_v13 }
  0x4d   :  { %1897 = vmatprep.subr.bf16.mxu1 %v2223_v0 }
  0x50   :  { %1898 = vmatpush3.bf16.msra.mxu1 %v2034_v14 }
  0x51   :  { %1899 = vmatprep.subr.bf16.mxu1 %v2223_v0 }
  0x54   :  { %1900 = vmatpush3.bf16.msra.mxu1 %v2035_v15 }
  0x55   :  { %1905 = vmatprep.subr.bf16.mxu1 %v2223_v0 }
  0x57   :  { %1902 = vmatmul.mubr.msk.bf16.vlgmr.msra.gmra.mxu1 %vm147_vm1, %v94_v18 }
  0x58   :  { %1907 = vmatprep.mubr.msk.bf16.mxu1 %vm2224_vm0, %v2223_v0 }
  0xff   :  { %v185_v20 = vpop.f32.mrf.mxu1 }
 0x100   :  { %v186_v38 = vadd.f32 %v185_v20, %v128_v32 }
 0x101   :  { %v1883_v21 = vpop.f32.mrf.mxu1 }
 0x102   :  { %v1817_v42 = vpack.c.bf16 %v186_v38, %v186_v38 }
 0x103   :  { %v188_v23 = vpop.f32.mrf.mxu1 }
 0x104   :  { %v189_v39 = vadd.f32 %v188_v23, %v128_v32 }
 0x105   :  { %v1884_v25 = vpop.f32.mrf.mxu1 }
 0x106   :  { %v324_v43 = vpack.c.bf16 %v189_v39, %v186_v38  ;;  %v1818_v45 = vpack.c.bf16 %v189_v39, %v189_v39 }
 0x10b   :  { %v251_v29 = vpop.f32.mrf.mxu1 }
 0x10c   :  { %v252_v30 = vadd.f32 %v251_v29, %v195_v27 }
 0x10d   :  { %v1893_v31 = vpop.f32.mrf.mxu1 }
 0x10e   :  { %v1819_v33 = vpack.c.bf16 %v252_v30, %v252_v30 }
 0x10f   :  { %v254_v34 = vpop.f32.mrf.mxu1 }
 0x110   :  { %v255_v35 = vadd.f32 %v254_v34, %v195_v27  ;;  %v401_v36 = vsel %vm396_vm2, %v1819_v33, 0 }
 0x111   :  { %v1894_v37 = vpop.f32.mrf.mxu1  ;;  %1906 = vmatpush3.bf16.xpose.msra.mxu1 %v401_v36 }
 0x112   :  { %v348_v40 = vpack.c.bf16 %v255_v35, %v252_v30  ;;  %1911 = vmatprep.subr.bf16.mxu1 %v2223_v0  ;;  %v1820_v41 = vpack.c.bf16 %v255_v35, %v255_v35 }
 0x114   :  { %352 = vrot.lane.b32.xlu1 %v348_v40, %s2225_s1  ;;  %350 = vrot.lane.b32.xlu0 %v348_v40, %s2226_s21  ;;  %v447_v44 = vsel %vm396_vm2, %v1820_v41, 0 }
 0x117   :  { %v317_v48 = vpop.f32.mrf.mxu1 }
 0x118   :  { %1908 = vmatmul.mubr.msk.bf16.vlgmr.msra.gmra.mxu1 %vm396_vm2, %v1817_v42  ;;  %328 = vrot.lane.b32.xlu1 %v324_v43, %s2225_s1  ;;  %v318_v50 = vadd.f32 %v317_v48, %v261_v47 }
 0x119   :  { %326 = vrot.lane.b32.xlu0 %v324_v43, %s2226_s21  ;;  %1912 = vmatpush3.bf16.xpose.msra.mxu1 %v447_v44  ;;  %v1903_v49 = vpop.f32.mrf.mxu1 }
 0x11a   :  { %1913 = vmatprep.mubr.msk.bf16.mxu1 %vm2224_vm0, %v2223_v0  ;;  %1923 = vmatprep.subr.bf16.mxu1 %v2223_v0  ;;  %v1821_v15 = vpack.c.bf16 %v318_v50, %v318_v50 }
 0x11b   :  { %v320_v51 = vpop.f32.mrf.mxu1 }
 0x11c   :  { %330 = vrot.lane.b32.xlu1 %v324_v43, %s2227_s22  ;;  %v321_v52 = vadd.f32 %v320_v51, %v261_v47  ;;  %v867_v20 = vsel %vm865_vm3, %v1821_v15, 0 }
 0x11d   :  { %354 = vrot.lane.b32.xlu0 %v348_v40, %s2227_s22  ;;  %v1904_v53 = vpop.f32.mrf.mxu1 }
 0x11e   :  { %v2389_v54 = vpack.c.bf16 %v321_v52, %v318_v50  ;;  %v1822_v16 = vpack.c.bf16 %v321_v52, %v321_v52 }
 0x120   :  { %1914 = vmatmul.mubr.msk.bf16.vlgmr.msra.gmra.mxu1 %vm396_vm2, %v1818_v45  ;;  %v913_v21 = vsel %vm865_vm3, %v1822_v16, 0 }
 0x121   :  { %1925 = vmatprep.mubr.msk.bf16.mxu1 %vm2224_vm0, %v2223_v0 }
 0x186   :  { %v351_v55 = vpop.permute.xlu0 %350  ;;  %v353_v60 = vpop.permute.xlu1 %352 }
 0x187   :  { %v1758_v56 = vcombine.low %v351_v55, %v351_v55  ;;  %v1759_v57 = vcombine.high %v351_v55, %v351_v55  ;;  %v1760_v62 = vcombine.low %v353_v60, %v353_v60  ;;  %v1761_v63 = vcombine.high %v353_v60, %v353_v60 }
 0x189   :  { %v493_v58 = vsel %vm396_vm2, %v1758_v56, 0  ;;  %v539_v59 = vsel %vm396_vm2, %v1759_v57, 0  ;;  %v585_v3 = vsel %vm396_vm2, %v1760_v62, 0  ;;  %v631_v6 = vsel %vm396_vm2, %v1761_v63, 0 }
 0x18a   :  { %1918 = vmatpush3.bf16.xpose.msra.mxu0 %v493_v58  ;;  %1924 = vmatpush3.bf16.xpose.msra.mxu1 %v539_v59  ;;  %v329_v8 = vpop.permute.xlu1 %328 }
 0x18b   :  { %1929 = vmatprep.subr.bf16.mxu0 %v2223_v0  ;;  %1935 = vmatprep.subr.bf16.mxu1 %v2223_v0  ;;  %v327_v61 = vpop.permute.xlu0 %326  ;;  %v1752_v11 = vcombine.low %v329_v8, %v329_v8  ;;  %v1753_v12 = vcombine.high %v329_v8, %v329_v8 }
 0x18c   :  { %v1750_v1 = vcombine.low %v327_v61, %v327_v61  ;;  %v1751_v2 = vcombine.high %v327_v61, %v327_v61 }
 0x18e   :  { %v331_v17 = vpop.permute.xlu1 %330 }
 0x18f   :  { %v355_v7 = vpop.permute.xlu0 %354  ;;  %v1754_v18 = vcombine.low %v331_v17, %v331_v17  ;;  %v1755_v19 = vcombine.high %v331_v17, %v331_v17 }
 0x190   :  { %v1762_v9 = vcombine.low %v355_v7, %v355_v7  ;;  %v1763_v10 = vcombine.high %v355_v7, %v355_v7 }
 0x191   :  { %1920 = vmatmul.mubr.msk.bf16.vlgmr.msra.gmra.mxu0 %vm396_vm2, %v1750_v1  ;;  %1926 = vmatmul.mubr.msk.bf16.vlgmr.msra.gmra.mxu1 %vm396_vm2, %v1751_v2 }
 0x192   :  { %1930 = vmatpush3.bf16.xpose.msra.mxu0 %v585_v3  ;;  %1936 = vmatpush3.bf16.xpose.msra.mxu1 %v631_v6  ;;  %v677_v13 = vsel %vm396_vm2, %v1762_v9, 0  ;;  %v723_v14 = vsel %vm396_vm2, %v1763_v10, 0 }
 0x193   :  { %1931 = vmatprep.mubr.msk.bf16.mxu0 %vm2224_vm0, %v2223_v0  ;;  %1937 = vmatprep.mubr.msk.bf16.mxu1 %vm2224_vm0, %v2223_v0 }
 0x194   :  { %1941 = vmatprep.subr.bf16.mxu0 %v2223_v0  ;;  %1947 = vmatprep.subr.bf16.mxu1 %v2223_v0 }
 0x199   :  { %1932 = vmatmul.mubr.msk.bf16.vlgmr.msra.gmra.mxu0 %vm396_vm2, %v1752_v11  ;;  %1938 = vmatmul.mubr.msk.bf16.vlgmr.msra.gmra.mxu1 %vm396_vm2, %v1753_v12 }
 0x19a   :  { %1942 = vmatpush3.bf16.xpose.msra.mxu0 %v677_v13  ;;  %1948 = vmatpush3.bf16.xpose.msra.mxu1 %v723_v14 }
 0x19b   :  { %1943 = vmatprep.mubr.msk.bf16.mxu0 %vm2224_vm0, %v2223_v0  ;;  %1949 = vmatprep.mubr.msk.bf16.mxu1 %vm2224_vm0, %v2223_v0 }
 0x19c   :  { %1953 = vmatprep.subr.bf16.mxu0 %v2223_v0  ;;  %1959 = vmatprep.subr.bf16.mxu1 %v2223_v0 }
 0x1a1   :  { %1944 = vmatmul.mubr.msk.bf16.vlgmr.msra.gmra.mxu0 %vm396_vm2, %v1754_v18  ;;  %1950 = vmatmul.mubr.msk.bf16.vlgmr.msra.gmra.mxu1 %vm396_vm2, %v1755_v19 }
 0x1a2   :  { %1954 = vmatpush3.bf16.msra.mxu0 %v867_v20  ;;  %1960 = vmatpush3.bf16.msra.mxu1 %v913_v21 }
 0x1a3   :  { %1961 = vmatprep.mubr.msk.bf16.mxu1 %vm2224_vm0, %v2223_v0  ;;  %1971 = vmatprep.subr.bf16.mxu1 %v2223_v0 }
 0x1a4   :  { %1955 = vmatprep.mubr.msk.bf16.mxu0 %vm2224_vm0, %v2223_v0  ;;  %1965 = vmatprep.subr.bf16.mxu0 %v2223_v0 }
 0x1d8   :  { %v437_v23 = vpop.f32.mrf.mxu1 }
 0x1d9   :  { %v766_v25 = vsel %vm765_vm4, %v437_v23, -inf }
 0x1da   :  { %767 = vmax.xlane.f32.xlu0 %v766_v25  ;;  %v1909_v27 = vpop.f32.mrf.mxu1 }
 0x1dc   :  { %v440_v29 = vpop.f32.mrf.mxu1 }
 0x1de   :  { %v1910_v30 = vpop.f32.mrf.mxu1 }
 0x1e0   :  { %v483_v31 = vpop.f32.mrf.mxu1 }
 0x1e1   :  { %v769_v32 = vsel %vm765_vm4, %v483_v31, -inf }
 0x1e2   :  { %770 = vmax.xlane.f32.xlu1 %v769_v32  ;;  %v1915_v33 = vpop.f32.mrf.mxu1 }
 0x1e4   :  { %v486_v34 = vpop.f32.mrf.mxu1 }
 0x1e6   :  { %v1916_v35 = vpop.f32.mrf.mxu1 }
 0x251   :  { %v529_v36 = vpop.f32.mrf.mxu0  ;;  %v575_v37 = vpop.f32.mrf.mxu1 }
 0x252   :  { %v772_v38 = vsel %vm765_vm4, %v529_v36, -inf  ;;  %v775_v43 = vsel %vm765_vm4, %v575_v37, -inf }
 0x253   :  { %v1921_v39 = vpop.f32.mrf.mxu0  ;;  %773 = vmax.xlane.f32.xlu0 %v772_v38  ;;  %v1927_v40 = vpop.f32.mrf.mxu1 }
 0x255   :  { %v532_v41 = vpop.f32.mrf.mxu0  ;;  %v578_v42 = vpop.f32.mrf.mxu1 }
 0x257   :  { %v1922_v44 = vpop.f32.mrf.mxu0  ;;  %776 = vmax.xlane.f32.xlu0 %v775_v43  ;;  %v1928_v45 = vpop.f32.mrf.mxu1 }
 0x259   :  { %v621_v46 = vpop.f32.mrf.mxu0  ;;  %v667_v47 = vpop.f32.mrf.mxu1 }
 0x25a   :  { %v778_v48 = vsel %vm765_vm4, %v621_v46, -inf  ;;  %v781_v49 = vsel %vm765_vm4, %v667_v47, -inf }
 0x25b   :  { %v1933_v50 = vpop.f32.mrf.mxu0  ;;  %779 = vmax.xlane.f32.xlu1 %v778_v48  ;;  %782 = vmax.xlane.f32.xlu0 %v781_v49  ;;  %v1939_v51 = vpop.f32.mrf.mxu1 }
 0x25d   :  { %v624_v52 = vpop.f32.mrf.mxu0  ;;  %v670_v53 = vpop.f32.mrf.mxu1 }
 0x25f   :  { %v1934_v55 = vpop.f32.mrf.mxu0  ;;  %v1940_v56 = vpop.f32.mrf.mxu1 }
 0x261   :  { %v713_v57 = vpop.f32.mrf.mxu0  ;;  %v759_v58 = vpop.f32.mrf.mxu1 }
 0x262   :  { %v784_v59 = vsel %vm765_vm4, %v713_v57, -inf  ;;  %v787_v60 = vsel %vm765_vm4, %v759_v58, -inf }
 0x263   :  { %v1945_v61 = vpop.f32.mrf.mxu0  ;;  %785 = vmax.xlane.f32.xlu1 %v784_v59  ;;  %788 = vmax.xlane.f32.xlu0 %v787_v60  ;;  %v1951_v62 = vpop.f32.mrf.mxu1 }
 0x264   :  { %v768_v9 = vpop.xlane.xlu0 %767 }
 0x265   :  { %v716_v63 = vpop.f32.mrf.mxu0  ;;  %v762_v1 = vpop.f32.mrf.mxu1  ;;  %v790_v12 = vsub.f32 %v437_v23, %v768_v9 }
 0x267   :  { %v1946_v2 = vpop.f32.mrf.mxu0  ;;  %v1952_v3 = vpop.f32.mrf.mxu1  ;;  %v798_v13 = vmul.f32 1.442695, %v790_v12 }
 0x26b   :  { %v771_v6 = vpop.xlane.xlu1 %770 }
 0x26c   :  { %v791_v7 = vsub.f32 %v483_v31, %v771_v6 }
 0x26e   :  { %v800_v8 = vmul.f32 1.442695, %v791_v7 }
 0x270   :  { %2060 = vpow2.f32 %v800_v8 }
 0x271   :  { %2062 = vpow2.f32 %v798_v13 }
 0x274   :  { %374 = vrot.lane.b32.xlu1 %v2389_v54, %s2226_s21 }
 0x27d   :  { %v2061_v10 = vpop.eup %2060 }
 0x27e   :  { %v817_v11 = vsel %vm765_vm4, %v2061_v10, 0.0  ;;  %v2436_v14 = vpop.eup %2062 }
 0x27f   :  { %818 = vadd.xlane.f32.xlu0 %v817_v11  ;;  %v814_v15 = vsel %vm765_vm4, %v2436_v14, 0.0 }
 0x298   :  { %815 = vadd.xlane.f32.xlu1 %v814_v15 }
 0x2dc   :  { %v774_v16 = vpop.xlane.xlu0 %773 }
 0x2dd   :  { %v792_v17 = vsub.f32 %v529_v36, %v774_v16 }
 0x2df   :  { %v802_v18 = vmul.f32 1.442695, %v792_v17 }
 0x2e0   :  { %v777_v19 = vpop.xlane.xlu0 %776 }
 0x2e1   :  { %2064 = vpow2.f32 %v802_v18  ;;  %v793_v20 = vsub.f32 %v575_v37, %v777_v19 }
 0x2e3   :  { %v804_v21 = vmul.f32 1.442695, %v793_v20 }
 0x2e4   :  { %v780_v25 = vpop.xlane.xlu1 %779  ;;  %v783_v27 = vpop.xlane.xlu0 %782 }
 0x2e5   :  { %2066 = vpow2.f32 %v804_v21  ;;  %v794_v23 = vsub.f32 %v621_v46, %v780_v25  ;;  %v795_v29 = vsub.f32 %v667_v47, %v783_v27 }
 0x2e7   :  { %v806_v30 = vmul.f32 1.442695, %v794_v23  ;;  %v808_v31 = vmul.f32 1.442695, %v795_v29 }
 0x2e9   :  { %2068 = vpow2.f32 %v806_v30 }
 0x2ea   :  { %2070 = vpow2.f32 %v808_v31 }
 0x2ec   :  { %v786_v32 = vpop.xlane.xlu1 %785  ;;  %v789_v33 = vpop.xlane.xlu0 %788 }
 0x2ed   :  { %v796_v34 = vsub.f32 %v713_v57, %v786_v32  ;;  %v797_v35 = vsub.f32 %v759_v58, %v789_v33 }
 0x2ee   :  { %v2065_v38 = vpop.eup %2064 }
 0x2ef   :  { %v810_v36 = vmul.f32 1.442695, %v796_v34  ;;  %v812_v39 = vmul.f32 1.442695, %v797_v35  ;;  %v820_v40 = vsel %vm765_vm4, %v2065_v38, 0.0 }
 0x2f0   :  { %821 = vadd.xlane.f32.xlu1 %v820_v40  ;;  %v375_v51 = vpop.permute.xlu1 %374 }
 0x2f1   :  { %2072 = vpow2.f32 %v810_v36  ;;  %v1767_v53 = vcombine.high %v375_v51, %v375_v51  ;;  %v1766_v60 = vcombine.low %v375_v51, %v375_v51 }
 0x2f2   :  { %v2067_v37 = vpop.eup %2066  ;;  %2074 = vpow2.f32 %v812_v39 }
 0x2f3   :  { %v823_v41 = vsel %vm765_vm4, %v2067_v37, 0.0  ;;  %v1005_v57 = vsel %vm865_vm3, %v1767_v53, 0 }
 0x2f4   :  { %824 = vadd.xlane.f32.xlu0 %v823_v41 }
 0x2f6   :  { %v2442_v42 = vpop.eup %2068 }
 0x2f7   :  { %v2444_v43 = vpop.eup %2070  ;;  %v826_v44 = vsel %vm765_vm4, %v2442_v42, 0.0 }
 0x2f8   :  { %827 = vadd.xlane.f32.xlu1 %v826_v44  ;;  %v829_v45 = vsel %vm765_vm4, %v2444_v43, 0.0 }
 0x2f9   :  { %830 = vadd.xlane.f32.xlu0 %v829_v45 }
 0x2fe   :  { %v2450_v46 = vpop.eup %2072 }
 0x2ff   :  { %v2452_v47 = vpop.eup %2074  ;;  %v832_v48 = vsel %vm765_vm4, %v2450_v46, 0.0 }
 0x300   :  { %833 = vadd.xlane.f32.xlu1 %v832_v48  ;;  %v835_v49 = vsel %vm765_vm4, %v2452_v47, 0.0 }
 0x301   :  { %836 = vadd.xlane.f32.xlu0 %v835_v49 }
 0x308   :  { %v819_v50 = vpop.xlane.xlu0 %818 }
 0x309   :  { %2076 = vrcp.f32 %v819_v50 }
 0x311   :  { %378 = vrot.lane.b32.xlu1 %v2389_v54, %s2227_s22 }
 0x316   :  { %v2077_v52 = vpop.eup %2076 }
 0x317   :  { %376 = vrot.lane.b32.xlu0 %v2389_v54, %s2225_s1  ;;  %v847_v55 = vmul.f32 %v2077_v52, %v2061_v10  ;;  %v959_v54 = vsel %vm865_vm3, %v1766_v60, 0  ;;  %v2037_v52 = vld [vmem:[%s2612_s3 + $0x50] sm:$0xff]  }
 0x319   :  { %v855_v56 = vpack.c.bf16 %v847_v55, %v847_v55 }
 0x31b   :  { %1962 = vmatmul.mubr.msk.bf16.vlgmr.msra.gmra.mxu1 %vm765_vm4, %v855_v56  ;;  %v2038_v56 = vld [vmem:[%s2612_s3 + $0x48] sm:$0xff]  }
 0x31c   :  { %1972 = vmatpush3.bf16.msra.mxu1 %v1005_v57  ;;  %1973 = vmatprep.mubr.msk.bf16.mxu1 %vm2224_vm0, %v2223_v0 }
 0x31d   :  { %1983 = vmatprep.subr.bf16.mxu1 %v2223_v0 }
 0x321   :  { %v816_v58 = vpop.xlane.xlu1 %815 }
 0x322   :  { %2078 = vrcp.f32 %v816_v58 }
 0x32f   :  { %v2079_v59 = vpop.eup %2078 }
 0x330   :  { %v846_v61 = vmul.f32 %v2079_v59, %v2436_v14 }
 0x332   :  { %v854_v62 = vpack.c.bf16 %v846_v61, %v846_v61 }
 0x334   :  { %1956 = vmatmul.mubr.msk.bf16.vlgmr.msra.gmra.mxu0 %vm765_vm4, %v854_v62 }
 0x335   :  { %1966 = vmatpush3.bf16.msra.mxu0 %v959_v54  ;;  %1967 = vmatprep.mubr.msk.bf16.mxu0 %vm2224_vm0, %v2223_v0 }
 0x336   :  { %1977 = vmatprep.subr.bf16.mxu0 %v2223_v0 }
 0x379   :  { %v822_v63 = vpop.xlane.xlu1 %821 }
 0x37a   :  { %2080 = vrcp.f32 %v822_v63 }
 0x37d   :  { %v825_v1 = vpop.xlane.xlu0 %824 }
 0x37e   :  { %2082 = vrcp.f32 %v825_v1 }
 0x381   :  { %v828_v2 = vpop.xlane.xlu1 %827 }
 0x382   :  { %2084 = vrcp.f32 %v828_v2  ;;  %v831_v3 = vpop.xlane.xlu0 %830 }
 0x383   :  { %2086 = vrcp.f32 %v831_v3 }
 0x387   :  { %v2081_v6 = vpop.eup %2080 }
 0x388   :  { %v848_v7 = vmul.f32 %v2081_v6, %v2065_v38 }
 0x389   :  { %v834_v8 = vpop.xlane.xlu1 %833 }
 0x38a   :  { %2088 = vrcp.f32 %v834_v8  ;;  %v837_v9 = vpop.xlane.xlu0 %836  ;;  %v856_v10 = vpack.c.bf16 %v848_v7, %v848_v7 }
 0x38b   :  { %v2083_v11 = vpop.eup %2082  ;;  %2090 = vrcp.f32 %v837_v9 }
 0x38c   :  { %1968 = vmatmul.mubr.msk.bf16.vlgmr.msra.gmra.mxu0 %vm765_vm4, %v856_v10  ;;  %v849_v12 = vmul.f32 %v2083_v11, %v2067_v37 }
 0x38d   :  { %1979 = vmatprep.mubr.msk.bf16.mxu0 %vm2224_vm0, %v2223_v0  ;;  %v379_v13 = vpop.permute.xlu1 %378 }
 0x38e   :  { %v377_v14 = vpop.permute.xlu0 %376  ;;  %v857_v15 = vpack.c.bf16 %v849_v12, %v849_v12  ;;  %v1770_v21 = vcombine.low %v379_v13, %v379_v13  ;;  %v1771_v30 = vcombine.high %v379_v13, %v379_v13 }
 0x38f   :  { %v2085_v16 = vpop.eup %2084  ;;  %v1768_v17 = vcombine.low %v377_v14, %v377_v14  ;;  %v1769_v18 = vcombine.high %v377_v14, %v377_v14 }
 0x390   :  { %v2087_v19 = vpop.eup %2086  ;;  %1974 = vmatmul.mubr.msk.bf16.vlgmr.msra.gmra.mxu1 %vm765_vm4, %v857_v15  ;;  %v850_v20 = vmul.f32 %v2085_v16, %v2442_v42  ;;  %v1143_v31 = vsel %vm865_vm3, %v1770_v21, 0  ;;  %v1189_v35 = vsel %vm865_vm3, %v1771_v30, 0 }
 0x391   :  { %v1051_v25 = vsel %vm865_vm3, %v1768_v17, 0  ;;  %v1097_v27 = vsel %vm865_vm3, %v1769_v18, 0  ;;  %1985 = vmatprep.mubr.msk.bf16.mxu1 %vm2224_vm0, %v2223_v0  ;;  %v851_v29 = vmul.f32 %v2087_v19, %v2444_v43 }
 0x392   :  { %1978 = vmatpush3.bf16.msra.mxu0 %v1051_v25  ;;  %1984 = vmatpush3.bf16.msra.mxu1 %v1097_v27  ;;  %v858_v23 = vpack.c.bf16 %v850_v20, %v850_v20  ;;  %v1276_v27 = vsub.s32 3, %v2359_v22 }
 0x393   :  { %1989 = vmatprep.subr.bf16.mxu0 %v2223_v0  ;;  %1995 = vmatprep.subr.bf16.mxu1 %v2223_v0  ;;  %v859_v32 = vpack.c.bf16 %v851_v29, %v851_v29 }
 0x395   :  { %1980 = vmatmul.mubr.msk.bf16.vlgmr.msra.gmra.mxu0 %vm765_vm4, %v858_v23  ;;  %v1277_v23 = vrot.slane %v2362_v26, %v1276_v27 }
 0x396   :  { %1990 = vmatpush3.bf16.msra.mxu0 %v1143_v31  ;;  %1991 = vmatprep.mubr.msk.bf16.mxu0 %vm2224_vm0, %v2223_v0 }
 0x397   :  { %v2089_v33 = vpop.eup %2088  ;;  %2001 = vmatprep.subr.bf16.mxu0 %v2223_v0 }
 0x398   :  { %v2091_v34 = vpop.eup %2090  ;;  %1986 = vmatmul.mubr.msk.bf16.vlgmr.msra.gmra.mxu1 %vm765_vm4, %v859_v32  ;;  %v852_v38 = vmul.f32 %v2089_v33, %v2450_v46 }
 0x399   :  { %1996 = vmatpush3.bf16.msra.mxu1 %v1189_v35  ;;  %1997 = vmatprep.mubr.msk.bf16.mxu1 %vm2224_vm0, %v2223_v0  ;;  %v853_v39 = vmul.f32 %v2091_v34, %v2452_v47  ;;  %v2036_v47 = vld [vmem:[%s2612_s3 + $0x58] sm:$0xff]   ;;  %s2230_s3 = smov 36  }
 0x39a   :  { %v860_v36 = vpack.c.bf16 %v852_v38, %v852_v38 }
 0x39b   :  { %v861_v40 = vpack.c.bf16 %v853_v39, %v853_v39 }
 0x39d   :  { %1992 = vmatmul.mubr.msk.bf16.vlgmr.msra.gmra.mxu0 %vm765_vm4, %v860_v36 }
 0x39e   :  { %2007 = vmatprep.mubr.msk.bf16.mxu0 %vm2224_vm0, %v2223_v0  ;;  %2002 = vmatpush3.bf16.msra.mxu0 %v2036_v47  ;;  %v2044_v47 = vld [vmem:[%s2613_s4 + $0x14] ss:$8 sps:$4 sm:$0xff]  }
 0x39f   :  { %2003 = vmatprep.subr.bf16.mxu0 %v2223_v0 }
 0x3a0   :  { %1998 = vmatmul.mubr.msk.bf16.vlgmr.msra.gmra.mxu1 %vm765_vm4, %v861_v40 }
 0x3a2   :  { %2004 = vmatpush3.bf16.msra.mxu0 %v2037_v52  ;;  %v2045_v52 = vld [vmem:[%s2613_s4] ss:$8 sps:$4 sm:$0xff]  }
 0x3a3   :  { %2005 = vmatprep.subr.bf16.mxu0 %v2223_v0 }
 0x3a6   :  { %2006 = vmatpush3.bf16.msra.mxu0 %v2038_v56  ;;  %v2049_v56 = vld [vmem:[%s2614_s5 + $0x30] sm:$0xff]  }
 0x3db   :  { %v949_v37 = vpop.f32.mrf.mxu1 }
 0x3dd   :  { %v1963_v41 = vpop.f32.mrf.mxu1 }
 0x3df   :  { %v952_v42 = vpop.f32.mrf.mxu1 }
 0x3e1   :  { %v1964_v43 = vpop.f32.mrf.mxu1 }
 0x3f4   :  { %v903_v44 = vpop.f32.mrf.mxu0 }
 0x3f5   :  { %v1823_v45 = vpack.c.bf16 %v949_v37, %v903_v44 }
 0x3f6   :  { %v1957_v46 = vpop.f32.mrf.mxu0 }
 0x3f8   :  { %v906_v48 = vpop.f32.mrf.mxu0 }
 0x3fa   :  { %v1958_v49 = vpop.f32.mrf.mxu0 }
 0x3fb   :  { %v2039_v49 = vld [vmem:[%s2613_s4 + $0x20] ss:$8 sps:$4 sm:$0xff]  }
 0x44c   :  { %v995_v50 = vpop.f32.mrf.mxu0 }
 0x44e   :  { %v1969_v51 = vpop.f32.mrf.mxu0 }
 0x44f   :  { %v2047_v51 = vld [vmem:[%s2613_s4 + $0x4] ss:$8 sps:$4 sm:$0xff]  }
 0x450   :  { %v998_v53 = vpop.f32.mrf.mxu0  ;;  %v1041_v55 = vpop.f32.mrf.mxu1 }
 0x451   :  { %v1824_v57 = vpack.c.bf16 %v1041_v55, %v995_v50  ;;  %v2042_v50 = vld [vmem:[%s2613_s4 + $0x10] ss:$8 sps:$4 sm:$0xff]   ;;  %v2231_v53 = vmov 0  }
 0x452   :  { %v1970_v58 = vpop.f32.mrf.mxu0  ;;  %v1975_v59 = vpop.f32.mrf.mxu1  ;;  %1463 = vmatprep.mubr.bf16.mxu1 %v2231_v53  ;;  %1616 = vmatprep.subr.bf16.mxu0 %v2231_v53  ;;  %v2048_v55 = vld [vmem:[%s2614_s5 + $0x38] sm:$0xff]  }
 0x453   :  { %1249 = vrot.lane.b32.xlu1 %v1824_v57, %s2228_s26 }
 0x454   :  { %v1044_v60 = vpop.f32.mrf.mxu1 }
 0x455   :  { %v1087_v61 = vpop.f32.mrf.mxu0 }
 0x456   :  { %v1976_v62 = vpop.f32.mrf.mxu1 }
 0x457   :  { %v1981_v54 = vpop.f32.mrf.mxu0 }
 0x458   :  { %v1133_v63 = vpop.f32.mrf.mxu1  ;;  %v1370_v54 = vsub.s32 4, %v2359_v22 }
 0x459   :  { %v1090_v1 = vpop.f32.mrf.mxu0  ;;  %v1825_v2 = vpack.c.bf16 %v1133_v63, %v1087_v61 }
 0x45a   :  { %v1987_v3 = vpop.f32.mrf.mxu1 }
 0x45b   :  { %v1982_v6 = vpop.f32.mrf.mxu0  ;;  %1256 = vrot.lane.b32.xlu0 %v1825_v2, %s2229_s27  ;;  %v1371_v2 = vrot.slane %v2362_v26, %v1370_v54  ;;  %v1376_v3 = vsub.s32 5, %v2359_v22 }
 0x45c   :  { %v1136_v7 = vpop.f32.mrf.mxu1 }
 0x45d   :  { %v1179_v8 = vpop.f32.mrf.mxu0 }
 0x45e   :  { %v1988_v9 = vpop.f32.mrf.mxu1 }
 0x45f   :  { %v1993_v0 = vpop.f32.mrf.mxu0  ;;  %v1377_v9 = vrot.slane %v2362_v26, %v1376_v3  ;;  %v2051_v26 = vld [vmem:[%s2614_s5 + $0x20] sm:$0xff]  }
 0x460   :  { %v1225_v10 = vpop.f32.mrf.mxu1 }
 0x461   :  { %v1182_v11 = vpop.f32.mrf.mxu0  ;;  %v1826_v12 = vpack.c.bf16 %v1225_v10, %v1179_v8 }
 0x462   :  { %v1999_v13 = vpop.f32.mrf.mxu1 }
 0x463   :  { %v1994_v14 = vpop.f32.mrf.mxu0  ;;  %1263 = vrot.lane.b32.xlu1 %v1826_v12, %s2230_s3  ;;  %v2050_v13 = vld [vmem:[%s2614_s5 + $0x28] sm:$0xff]  }
 0x464   :  { %v1228_v15 = vpop.f32.mrf.mxu1  ;;  %v2052_v14 = vld [vmem:[%s2614_s5 + $0x18] sm:$0xff]  }
 0x465   :  { %v2053_v15 = vld [vmem:[%s2614_s5 + $0x10] sm:$0xff]  }
 0x466   :  { %v2000_v16 = vpop.f32.mrf.mxu1 }
 0x467   :  { %v2054_v16 = vld [vmem:[%s2614_s5 + $0x8] sm:$0xff]  }
 0x4c5   :  { %v1250_v17 = vpop.permute.xlu1 %1249 }
 0x4c6   :  { %v1267_v19 = vsel %vm396_vm2, %v1823_v45, %v1250_v17  ;;  %v2055_v17 = vld [vmem:[%s2614_s5] sm:$0xff]  }
 0x4cd   :  { %v1257_v18 = vpop.permute.xlu0 %1256 }
 0x4ce   :  { %v1270_v20 = vsel %vm1268_vm5, %v1267_v19, %v1257_v18  ;;  %v2056_v18 = vld [vmem:[%s2614_s5 + $0x58] sm:$0xff]   ;;  %v2057_v19 = vld [vmem:[%s2614_s5 + $0x50] sm:$0xff]  }
 0x4d5   :  { %v1264_v21 = vpop.permute.xlu1 %1263 }
 0x4d6   :  { %v1273_v25 = vsel %vm1271_vm6, %v1270_v20, %v1264_v21  ;;  %v2058_v20 = vld [vmem:[%s2614_s5 + $0x48] sm:$0xff]   ;;  %v2059_v21 = vld [vmem:[%s2614_s5 + $0x40] sm:$0xff]   ;;  %s2232_s5 = smov [#allocation10]  }
 0x4d7   :  { %2008 = vmatmul.mubr.msk.bf16.vlgmr.msra.gmra.mxu0 %vm147_vm1, %v1273_v25  ;;  %v124_v25 = vld [vmem:[%s2616_s7] sm:$0x3]  ;;  %s1704_s7 = sshll.u32 %s2232_s5, 4  ;;  %s1705_s7 = int_to_ptr.vmem [resolvable:$true] %s1704_s7 }
 0x4d8   :  { %1617 = vmatpush1.bf16.msra.mxu0 %v2048_v55  ;;  %v1391_v27 = vrot.slane %v124_v25, %v127_v28  ;;  %s2189_s20 = scalar_lea.vmem %s1705_s7, 256  ;;  %p2194_p7 = scmp.lt.s32.totalorder %s1705_s7, %s1705_s7 }
 0x4d9   :  { %1618 = vmatprep.subr.bf16.mxu0 %v2231_v53  ;;  %p2190_p6 = scmp.ne.s32.totalorder %s1705_s7, %s2189_s20  ;;  %p2195_p8 = scmp.lt.s32.totalorder %s2189_s20, %s2189_s20 }
 0x4db   :  { %p2196_p9 = por %p2195_p8, %p2194_p7 }
 0x4dc   :  { %1619 = vmatpush1.bf16.msra.mxu0 %v2049_v56 }
 0x4dd   :  { %1620 = vmatprep.subr.bf16.mxu0 %v2231_v53  ;;  %p2197_p10 = pnand %p2196_p9, %p2190_p6 }
 0x4e0   :  { %1621 = vmatpush1.bf16.msra.mxu0 %v2050_v13 }
 0x4e1   :  { %1622 = vmatprep.subr.bf16.mxu0 %v2231_v53 }
 0x4e4   :  { %1623 = vmatpush1.bf16.msra.mxu0 %v2051_v26 }
 0x4e5   :  { %1624 = vmatprep.subr.bf16.mxu0 %v2231_v53 }
 0x4e8   :  { %1625 = vmatpush1.bf16.msra.mxu0 %v2052_v14 }
 0x4e9   :  { %1626 = vmatprep.subr.bf16.mxu0 %v2231_v53 }
 0x4ec   :  { %1627 = vmatpush1.bf16.msra.mxu0 %v2053_v15 }
 0x4ed   :  { %1628 = vmatprep.subr.bf16.mxu0 %v2231_v53 }
 0x4f0   :  { %1629 = vmatpush1.bf16.msra.mxu0 %v2054_v16 }
 0x4f1   :  { %1630 = vmatprep.subr.bf16.mxu0 %v2231_v53 }
 0x4f4   :  { %1631 = vmatpush1.bf16.msra.mxu0 %v2055_v17 }
 0x4f5   :  { %1640 = vmatprep.subr.bf16.mxu0 %v2231_v53 }
 0x4f8   :  { %1641 = vmatpush2.bf16.msra.mxu0 %v2056_v18 }
 0x4f9   :  { %1642 = vmatprep.subr.bf16.mxu0 %v2231_v53 }
 0x4fc   :  { %1643 = vmatpush2.bf16.msra.mxu0 %v2057_v19 }
 0x4fd   :  { %1644 = vmatprep.subr.bf16.mxu0 %v2231_v53 }
 0x500   :  { %1645 = vmatpush2.bf16.msra.mxu0 %v2058_v20 }
 0x501   :  { %1646 = vmatprep.subr.bf16.mxu0 %v2231_v53 }
 0x504   :  { %1647 = vmatpush2.bf16.msra.mxu0 %v2059_v21 }
 0x597   :  { %v1332_v29 = vpop.f32.mrf.mxu0 }
 0x598   :  { %v1333_v30 = vadd.f32 %v1332_v29, %v1277_v23 }
 0x599   :  { %v2009_v31 = vpop.f32.mrf.mxu0 }
 0x59a   :  { %v1339_v32 = vadd.f32 %v1333_v30, %v2318_v4 }
 0x59b   :  { %v1335_v33 = vpop.f32.mrf.mxu0 }
 0x59c   :  { %v1336_v34 = vadd.f32 %v1335_v33, %v1277_v23  ;;  %v1341_v35 = vsel %vm147_vm1, %v1339_v32, 0.0  ;;  %v1395_v23 = vrot.slane %v124_v25, %v194_v24 }
 0x59d   :  { %1342 = vadd.xlane.f32.xlu0 %v1341_v35  ;;  %v2010_v38 = vpop.f32.mrf.mxu0 }
 0x59e   :  { %v1340_v36 = vadd.f32 %v1336_v34, %v2320_v5  ;;  %v2041_v5 = vld [vmem:[%s2613_s4 + $0x24] ss:$8 sps:$4 sm:$0xff]  }
 0x59f   :  { %1441 = vmatprep.subr.bf16.mxu1 %v2041_v5 }
 0x5a0   :  { %v1344_v39 = vsel %vm147_vm1, %v1340_v36, 0.0  ;;  %1442 = vmatpush1.bf16.msra.mxu1 %v2039_v49 }
 0x5a1   :  { %1345 = vadd.xlane.f32.xlu1 %v1344_v39  ;;  %1443 = vmatprep.subr.bf16.mxu1 %v2044_v47 }
 0x5a4   :  { %1444 = vmatpush1.bf16.msra.mxu1 %v2042_v50 }
 0x5a5   :  { %1445 = vmatprep.subr.bf16.mxu1 %v2047_v51 }
 0x5a8   :  { %1446 = vmatpush1.bf16.msra.mxu1 %v2045_v52 }
 0x626   :  { %v1343_v40 = vpop.xlane.xlu0 %1342 }
 0x627   :  { %v1348_v37 = vmul.f32 0.020833334, %v1343_v40 }
 0x629   :  { %v1350_v41 = vsub.f32 %v1339_v32, %v1348_v37 }
 0x62a   :  { %v1346_v42 = vpop.xlane.xlu1 %1345 }
 0x62b   :  { %v1349_v43 = vmul.f32 0.020833334, %v1346_v42  ;;  %v1352_v44 = vmul.f32 %v1350_v41, %v1350_v41 }
 0x62d   :  { %v1351_v45 = vsub.f32 %v1340_v36, %v1349_v43  ;;  %v1354_v4 = vsel %vm147_vm1, %v1352_v44, 0.0 }
 0x62e   :  { %1355 = vadd.xlane.f32.xlu0 %v1354_v4 }
 0x62f   :  { %v1353_v46 = vmul.f32 %v1351_v45, %v1351_v45 }
 0x631   :  { %v1357_v48 = vsel %vm147_vm1, %v1353_v46, 0.0 }
 0x632   :  { %1358 = vadd.xlane.f32.xlu0 %v1357_v48 }
 0x6b7   :  { %v1356_v57 = vpop.xlane.xlu0 %1355 }
 0x6b8   :  { %v1360_v58 = vmul.f32 0.020833334, %v1356_v57 }
 0x6ba   :  { %v1362_v59 = vadd.f32 1e-06, %v1360_v58 }
 0x6bb   :  { %v1359_v60 = vpop.xlane.xlu0 %1358 }
 0x6bc   :  { %2092 = vrsqrt.f32 %v1362_v59  ;;  %v1361_v61 = vmul.f32 0.020833334, %v1359_v60 }
 0x6be   :  { %v1363_v62 = vadd.f32 1e-06, %v1361_v61 }
 0x6c0   :  { %2094 = vrsqrt.f32 %v1363_v62 }
 0x6c9   :  { %v2093_v63 = vpop.eup %2092 }
 0x6ca   :  { %v1366_v1 = vmul.f32 %v2093_v63, %v1350_v41 }
 0x6cc   :  { %v1372_v8 = vmul.f32 %v1371_v2, %v1366_v1 }
 0x6cd   :  { %v2095_v6 = vpop.eup %2094 }
 0x6ce   :  { %v1367_v7 = vmul.f32 %v2095_v6, %v1351_v45  ;;  %v2549_v10 = vadd.f32 %v1377_v9, %v1372_v8 }
 0x6d0   :  { %v1373_v0 = vmul.f32 %v1371_v2, %v1367_v7 }
 0x6d2   :  { %v2551_v11 = vadd.f32 %v1377_v9, %v1373_v0  ;;  %v1803_v0 = vld [vmem:[#allocation8 + $0x8] ss:$0 sm:$0xff] }
 0x6d4   :  { %v1380_v12 = vpack.c.bf16 %v2551_v11, %v2549_v10 }
 0x6d6   :  { %1802 = vmatmul.mubr.msk.bf16.vlgmr.msra.gmra.mxu1 %vm147_vm1, %v1380_v12 }
 0x796   :  { %v1465_v29 = vpop.f32.mrf.mxu1 }
 0x797   :  { %v1466_v30 = vadd.f32 %v1465_v29, %v1391_v27 }
 0x798   :  { %v1467_v31 = vpop.f32.mrf.mxu1 }
 0x799   :  { %v1478_v32 = vmul.f32 0.044715, %v1466_v30  ;;  %v1468_v33 = vadd.f32 %v1467_v31, %v1395_v23  ;;  %v1474_v1 = vmul.f32 0.5, %v1466_v30 }
 0x79a   :  { %v1469_v34 = vpop.f32.mrf.mxu1 }
 0x79b   :  { %v1482_v35 = vmul.f32 %v1478_v32, %v1466_v30  ;;  %v1479_v38 = vmul.f32 0.044715, %v1468_v33  ;;  %v1470_v36 = vadd.f32 %v1469_v34, %v1391_v27  ;;  %v1475_v62 = vmul.f32 0.5, %v1468_v33 }
 0x79c   :  { %v1471_v39 = vpop.f32.mrf.mxu1 }
 0x79d   :  { %v1486_v40 = vmul.f32 %v1482_v35, %v1466_v30  ;;  %v1483_v37 = vmul.f32 %v1479_v38, %v1468_v33  ;;  %v1480_v41 = vmul.f32 0.044715, %v1470_v36  ;;  %v1472_v42 = vadd.f32 %v1471_v39, %v1395_v23 }
 0x79e   :  { %v1476_v60 = vmul.f32 0.5, %v1470_v36 }
 0x79f   :  { %v1490_v43 = vadd.f32 %v1486_v40, %v1466_v30  ;;  %v1487_v44 = vmul.f32 %v1483_v37, %v1468_v33  ;;  %v1484_v28 = vmul.f32 %v1480_v41, %v1470_v36  ;;  %v1481_v45 = vmul.f32 0.044715, %v1472_v42  ;;  %v2108_v41 = vld [vmem:[#allocation8] sm:$0xff] }
 0x7a0   :  { %v1477_v54 = vmul.f32 0.5, %v1472_v42  ;;  %v1687_v40 = vsub.s32 6, %v2359_v22  ;;  %v1693_v37 = vsub.s32 7, %v2359_v22 }
 0x7a1   :  { %v1491_v4 = vadd.f32 %v1487_v44, %v1468_v33  ;;  %v1488_v24 = vmul.f32 %v1484_v28, %v1470_v36  ;;  %v1485_v46 = vmul.f32 %v1481_v45, %v1472_v42  ;;  %v1494_v48 = vmul.f32 0.7978846, %v1490_v43 }
 0x7a2   :  { %v1694_v28 = vrot.slane %v2108_v41, %v1693_v37 }
 0x7a3   :  { %v1495_v5 = vmul.f32 0.7978846, %v1491_v4  ;;  %v1492_v49 = vadd.f32 %v1488_v24, %v1470_v36  ;;  %v1489_v47 = vmul.f32 %v1485_v46, %v1472_v42 }
 0x7a5   :  { %2096 = vtanh.f32 %v1495_v5  ;;  %v1496_v50 = vmul.f32 0.7978846, %v1492_v49  ;;  %v1493_v51 = vadd.f32 %v1489_v47, %v1472_v42  ;;  %v1688_v42 = vrot.slane %v2108_v41, %v1687_v40 }
 0x7a6   :  { %2098 = vtanh.f32 %v1494_v48 }
 0x7a7   :  { %2100 = vtanh.f32 %v1496_v50  ;;  %v1497_v52 = vmul.f32 0.7978846, %v1493_v51 }
 0x7a9   :  { %2102 = vtanh.f32 %v1497_v52 }
 0x7b2   :  { %v2097_v53 = vpop.eup %2096 }
 0x7b3   :  { %v2099_v55 = vpop.eup %2098  ;;  %v1503_v57 = vadd.f32 1.0, %v2097_v53 }
 0x7b4   :  { %v2101_v56 = vpop.eup %2100  ;;  %v1502_v61 = vadd.f32 1.0, %v2099_v55 }
 0x7b5   :  { %v1504_v58 = vadd.f32 1.0, %v2101_v56  ;;  %v1507_v3 = vmul.f32 %v1503_v57, %v1475_v62 }
 0x7b6   :  { %v2103_v59 = vpop.eup %2102  ;;  %v1506_v7 = vmul.f32 %v1502_v61, %v1474_v1 }
 0x7b7   :  { %v1505_v63 = vadd.f32 1.0, %v2103_v59  ;;  %v1508_v2 = vmul.f32 %v1504_v58, %v1476_v60 }
 0x7b9   :  { %v1509_v6 = vmul.f32 %v1505_v63, %v1477_v54  ;;  %v1510_v9 = vpack.c.bf16 %v1508_v2, %v1506_v7 }
 0x7bb   :  { %v1511_v8 = vpack.c.bf16 %v1509_v6, %v1507_v3 }
 0x7bd   :  { %1816 = vmatprep.mubr.msk.bf16.mxu0 %vm1612_vm7, %v1511_v8 }
 0x7be   :  { %1649 = vmatmul.mubr.bf16.vlgmr.msra.gmra.mxu0 %v1510_v9 }
 0x87e   :  { %v1650_v12 = vpop.f32.mrf.mxu0 }
 0x87f   :  { %v1651_v13 = vadd.f32 %v1803_v0, %v1650_v12 }
 0x880   :  { %v1652_v26 = vpop.f32.mrf.mxu0 }
 0x881   :  { %v1657_v14 = vadd.f32 %v1651_v13, %v2549_v10 }
 0x882   :  { %v1653_v15 = vpop.f32.mrf.mxu0 }
 0x883   :  { %v1654_v16 = vadd.f32 %v1803_v0, %v1653_v15  ;;  %v1659_v17 = vsel %vm147_vm1, %v1657_v14, 0.0 }
 0x884   :  { %v1655_v18 = vpop.f32.mrf.mxu0  ;;  %1660 = vadd.xlane.f32.xlu1 %v1659_v17 }
 0x885   :  { %v1658_v19 = vadd.f32 %v1654_v16, %v2551_v11 }
 0x887   :  { %v1662_v20 = vsel %vm147_vm1, %v1658_v19, 0.0 }
 0x888   :  { %1663 = vadd.xlane.f32.xlu0 %v1662_v20 }
 0x90d   :  { %v1661_v21 = vpop.xlane.xlu1 %1660 }
 0x90e   :  { %v1665_v25 = vmul.f32 0.020833334, %v1661_v21 }
 0x910   :  { %v1667_v27 = vsub.f32 %v1657_v14, %v1665_v25 }
 0x911   :  { %v1664_v23 = vpop.xlane.xlu0 %1663 }
 0x912   :  { %v1666_v29 = vmul.f32 0.020833334, %v1664_v23  ;;  %v1669_v30 = vmul.f32 %v1667_v27, %v1667_v27 }
 0x914   :  { %v1668_v31 = vsub.f32 %v1658_v19, %v1666_v29  ;;  %v1671_v10 = vsel %vm147_vm1, %v1669_v30, 0.0 }
 0x915   :  { %1672 = vadd.xlane.f32.xlu1 %v1671_v10 }
 0x916   :  { %v1670_v32 = vmul.f32 %v1668_v31, %v1668_v31 }
 0x918   :  { %v1674_v33 = vsel %vm147_vm1, %v1670_v32, 0.0 }
 0x919   :  { %1675 = vadd.xlane.f32.xlu0 %v1674_v33 }
 0x99e   :  { %v1673_v34 = vpop.xlane.xlu1 %1672 }
 0x99f   :  { %v1677_v35 = vmul.f32 0.020833334, %v1673_v34 }
 0x9a1   :  { %v1679_v11 = vadd.f32 1e-06, %v1677_v35 }
 0x9a2   :  { %v1676_v38 = vpop.xlane.xlu0 %1675 }
 0x9a3   :  { %2104 = vrsqrt.f32 %v1679_v11  ;;  %v1678_v36 = vmul.f32 0.020833334, %v1676_v38 }
 0x9a5   :  { %v1680_v39 = vadd.f32 1e-06, %v1678_v36 }
 0x9a7   :  { %2106 = vrsqrt.f32 %v1680_v39 }
 0x9b0   :  { %v2105_v43 = vpop.eup %2104 }
 0x9b1   :  { %v1683_v44 = vmul.f32 %v2105_v43, %v1667_v27 }
 0x9b3   :  { %v1689_v45 = vmul.f32 %v1688_v42, %v1683_v44 }
 0x9b4   :  { %v2107_v4 = vpop.eup %2106 }
 0x9b5   :  { %v1684_v24 = vmul.f32 %v2107_v4, %v1668_v31  ;;  %v1695_v46 = vadd.f32 %v1694_v28, %v1689_v45 }
 0x9b7   :  { %v1690_v48 = vmul.f32 %v1688_v42, %v1684_v24  ;;  %1697 = vst.msk [vmem:[#allocation10] sm:$0xff] %vm147_vm1, %v1695_v46 }
 0x9b9   :  { %v1696_v5 = vadd.f32 %v1694_v28, %v1690_v48 }
 0x9bb   :  { %1698 = vst.msk [vmem:[#allocation10 + $0x8] sm:$0xff] %vm147_vm1, %v1696_v5 }
 0x9bc   :  { %2200 = shalt.err (!%p2197_p10)
}
 0x9bd   :  { %1710 = dma.vmem_to_hbm [thread:$0]  %s1705_s7, 256, %s2617_s8, [#allocation4], %s2219_s10, %s2219_s10, %s2220_s11  }
 0x9be   :  { %2215 = dma.done.wait [#allocation4], 256  }
 0x9bf   :  { %2216 = vsyncadd [#allocation4], 4294967040 }
 0x9c0   :  { %1714 = vsyncpa [#allocation3], 1 }
 0x9c1   :  { %1715 = vsyncpa [#allocation6], 1 }
 0x9c2   :  { %1716 = vsyncpa [#allocation9], 1 }
 0x9c3   :  { %1717 = vsyncpa [#allocation4], 1 }

</bundles_post_ra>
